<compile_context>
chip_gen: v7x
topology: tpu7x:2x2x1
jax: 0.10.0
libtpu: 0.0.40
codegen_flags: <defaults>
</compile_context>

<pallas_src>
import functools

import jax
import jax.numpy as jnp
from jax.experimental import pallas as pl
from jax.experimental.pallas import tpu as pltpu


# --------------------------------------------------------------------------
# Small helpers: generation-aware VMEM budget, single-buffered BlockSpecs,
# footprint-aware tile selection.
# --------------------------------------------------------------------------
def _vmem_limit_bytes():
    """Scoped-VMEM limit derived from the chip's capacity (with headroom)."""
    try:
        cap = int(pltpu.get_tpu_info().vmem_capacity_bytes)
    except Exception:
        cap = 64 * 1024 * 1024            # conservative (v7x-sized) fallback
    return max(16 * 1024 * 1024, (cap * 3) // 4)


def _spec(shape, index_map, single_buffered=False):
    """BlockSpec; grid-(quasi-)invariant operands get a single VMEM buffer."""
    if single_buffered:
        try:
            return pl.BlockSpec(shape, index_map, pipeline_mode=pl.Buffered(1))
        except (TypeError, AttributeError):
            pass                          # older jax: only lose the VMEM saving
    return pl.BlockSpec(shape, index_map)


def _pick_tile(n, fits, divisor_ok=lambda t: True):
    """Largest tile that divides n, satisfies layout constraints and the VMEM budget."""
    cands = [n] + [t for t in (2048, 1024, 512, 256, 128, 64, 32, 16, 8)
                   if t < n and n % t == 0 and divisor_ok(t)]
    for t in cands:
        if fits(t):
            return t
    return cands[-1]


# --------------------------------------------------------------------------
# Stage 1: spatial reduction + LayerNorm + K (all heads, one dot) + folded V
# --------------------------------------------------------------------------
def _kv_kernel(use_sr, num_heads, hd, compute_dtype, *refs):
    if use_sr:
        (xp_ref, wsr_ref, bsr_ref, gamma_ref, beta_ref,
         wk_ref, bk_ref, wvp_ref, bvp_ref, k_out_ref, vp_out_ref) = refs
    else:
        (xp_ref, wk_ref, bk_ref, wvp_ref, bvp_ref, k_out_ref, vp_out_ref) = refs

    if use_sr:
        xp = xp_ref[0]                                        # (TKV, Cp) bf16
        # sr x sr conv with stride sr == patch matmul; LayerNorm in f32 (eps=1e-5).
        x_ = jnp.dot(xp, wsr_ref[...], preferred_element_type=jnp.float32)
        x_ = x_ + bsr_ref[...]
        mu = jnp.mean(x_, axis=-1, keepdims=True)
        var = jnp.mean((x_ - mu) ** 2, axis=-1, keepdims=True)
        x_ = (x_ - mu) * jax.lax.rsqrt(var + 1e-5)
        x_ = x_ * gamma_ref[...] + beta_ref[...]
        xc = x_.astype(compute_dtype)
    else:
        xc = xp_ref[0].astype(compute_dtype)                  # (TKV, C)

    # K for ALL heads with a single (TKV,C)@(C,C) MXU dot; one XLU transpose makes
    # the stored K lane-dense (Nkv on lanes) for stage 2.
    k_full = jnp.dot(xc, wk_ref[...], preferred_element_type=jnp.float32)
    k_full = k_full + bk_ref[...]
    k_t = k_full.astype(k_out_ref.dtype).T                    # (C, TKV)
    for h in range(num_heads):
        k_out_ref[0, h] = k_t[h * hd:(h + 1) * hd, :]         # (hd, TKV)

    # V folded with the matching Wproj slice; per-head (C,C) weights genuinely differ.
    for h in range(num_heads):
        vp_h = jnp.dot(xc, wvp_ref[h], preferred_element_type=jnp.float32)
        vp_h = vp_h + bvp_ref[h]
        vp_out_ref[0, h] = vp_h.astype(vp_out_ref.dtype)      # (TKV, C)


# --------------------------------------------------------------------------
# Stage 2: query-tiled attention with a single fused PV matmul
# --------------------------------------------------------------------------
def _attn_kernel(num_heads, hd, compute_dtype,
                 x_ref, k_ref, vp_ref, wq_ref, bq_ref, bproj_ref, out_ref):
    xc = x_ref[0].astype(compute_dtype)                       # (TN, C)

    # Q for ALL heads with one (TN,C)@(C,C) dot (scale folded into wq / bq).
    q_full = jnp.dot(xc, wq_ref[...], preferred_element_type=jnp.float32)
    q_full = q_full + bq_ref[...]                              # (TN, C) f32

    probs = []
    for h in range(num_heads):
        qh = q_full[:, h * hd:(h + 1) * hd].astype(compute_dtype)     # (TN, hd)
        s = jnp.dot(qh, k_ref[0, h], preferred_element_type=jnp.float32)  # (TN, Nkv)
        m = jnp.max(s, axis=-1, keepdims=True)
        e = jnp.exp(s - m)
        denom = jnp.sum(e, axis=-1, keepdims=True)
        # EUP reciprocal + one Newton-Raphson step: near-exact, negligible VPU cost.
        r = pl.reciprocal(denom, approx=True)
        r = r * (2.0 - denom * r)
        probs.append((e * r).astype(compute_dtype))

    # Single fused PV matmul: lane-concatenate per-head probabilities (aligned,
    # Nkv % 128 == 0) and contract against the flat folded-V (nh*Nkv, C).
    probs_cat = jnp.concatenate(probs, axis=-1)                # (TN, nh*Nkv)
    acc = jnp.dot(probs_cat, vp_ref[0], preferred_element_type=jnp.float32)  # (TN, C)

    out_ref[0] = (acc + bproj_ref[...]).astype(out_ref.dtype)


# --------------------------------------------------------------------------
# Wrapper
# --------------------------------------------------------------------------
def efficient_self_attention(x, H, W, p, num_heads, sr_ratio,
                             compute_dtype=jnp.bfloat16):
    B, N, C = x.shape
    hd = C // num_heads
    scale = float(hd) ** -0.5
    use_sr = sr_ratio > 1
    cdt = compute_dtype
    cbytes = jnp.dtype(cdt).itemsize
    xbytes = jnp.dtype(x.dtype).itemsize

    vmem_limit = _vmem_limit_bytes()
    budget = int(vmem_limit * 0.7)          # share of the limit our blocks may claim

    # ---- host-side weight prep (per-head slicing, scale / Wproj folding, bf16 cast)
    wq, bq = p['wq'], p['bq']
    wkv, bkv = p['wkv'], p['bkv']
    wproj, bproj = p['wproj'], p['bproj']

    wq_t = (wq.T * scale).astype(cdt)                               # (C, C)
    bq_r = (bq * scale).reshape(1, C).astype(jnp.float32)
    wk_t = wkv[:C].T.astype(cdt)                                    # (C, C)
    bk_r = bkv[:C].reshape(1, C).astype(jnp.float32)
    wv, bv = wkv[C:], bkv[C:]
    wproj_t = wproj.T
    wvp_heads = jnp.stack([wv[h * hd:(h + 1) * hd].T @ wproj_t[h * hd:(h + 1) * hd]
                           for h in range(num_heads)]).astype(cdt)  # (nh, C, C)
    bvp_heads = jnp.stack([(bv[h * hd:(h + 1) * hd] @ wproj_t[h * hd:(h + 1) * hd]
                            ).reshape(1, C)
                           for h in range(num_heads)]).astype(jnp.float32)  # (nh,1,C)
    bproj_r = bproj.reshape(1, C).astype(jnp.float32)

    # ---- stage 1 inputs -----------------------------------------------------
    if use_sr:
        Hs, Ws = H // sr_ratio, W // sr_ratio
        Nkv = Hs * Ws
        Cp = C * sr_ratio * sr_ratio
        # NHWC patching: free reshape + one cheap non-minor-dim transpose; the patch
        # tensor is emitted directly in compute_dtype (halves its DMA).
        xp = x.reshape(B, Hs, sr_ratio, Ws, sr_ratio, C)
        xp = jnp.transpose(xp, (0, 1, 3, 2, 4, 5)).reshape(B, Nkv, Cp).astype(cdt)
        wsr_t = jnp.transpose(p['wsr'], (2, 3, 1, 0)).reshape(Cp, C).astype(cdt)
        bsr = p['bsr'].reshape(1, C).astype(jnp.float32)
        gamma = p['gamma'].reshape(1, C).astype(jnp.float32)
        beta = p['beta'].reshape(1, C).astype(jnp.float32)
        xp_bytes = cbytes
    else:
        Nkv, Cp = N, C
        xp = x                     # read once; cast in-kernel (no extra HBM pass)
        xp_bytes = xbytes

    w1_bytes = ((Cp * C * cbytes) if use_sr else 0) + C * C * cbytes \
        + num_heads * C * C * cbytes + 8 * C * 4

    def kv_fits(t):
        blocks = 2 * t * Cp * xp_bytes                      # xp (double-buffered)
        blocks += 2 * num_heads * hd * t * cbytes           # K out
        blocks += 2 * num_heads * t * C * cbytes            # VP out
        temps = 4 * t * C * 4                               # conv/LN/K f32 temporaries
        return w1_bytes + blocks + temps <= budget

    # k_out has TKV on the lane axis -> TKV must be a multiple of 128 or == Nkv.
    TKV = _pick_tile(Nkv, kv_fits, divisor_ok=lambda t: t % 128 == 0)

    def _rep(a):
        nd = a.ndim
        return _spec(a.shape, lambda b, t: (0,) * nd, single_buffered=True)

    kv_inputs = [xp]
    kv_specs = [_spec((1, TKV, Cp), lambda b, t: (b, t, 0))]
    if use_sr:
        kv_inputs += [wsr_t, bsr, gamma, beta]
        kv_specs += [_rep(a) for a in (wsr_t, bsr, gamma, beta)]
    kv_inputs += [wk_t, bk_r, wvp_heads, bvp_heads]
    kv_specs += [_rep(a) for a in (wk_t, bk_r, wvp_heads, bvp_heads)]

    k_all, vp_all = pl.pallas_call(
        functools.partial(_kv_kernel, use_sr, num_heads, hd, cdt),
        out_shape=(jax.ShapeDtypeStruct((B, num_heads, hd, Nkv), cdt),
                   jax.ShapeDtypeStruct((B, num_heads, Nkv, C), cdt)),
        grid=(B, Nkv // TKV),
        in_specs=kv_specs,
        out_specs=(pl.BlockSpec((1, num_heads, hd, TKV), lambda b, t: (b, 0, 0, t)),
                   pl.BlockSpec((1, num_heads, TKV, C), lambda b, t: (b, 0, t, 0))),
        compiler_params=pltpu.CompilerParams(
            dimension_semantics=("parallel", "parallel"),
            vmem_limit_bytes=vmem_limit),
    )(*kv_inputs)

    # Flat (nh*Nkv, C) view for the fused PV matmul (metadata-only reshape).
    vp_flat = vp_all.reshape(B, num_heads * Nkv, C)

    # ---- stage 2: query-tiled attention --------------------------------------
    kv_res_bytes = num_heads * hd * Nkv * cbytes + num_heads * Nkv * C * cbytes \
        + C * C * cbytes + 2 * C * 4

    def attn_fits(t):
        blocks = 2 * t * C * xbytes + 2 * t * C * xbytes      # x + out (double-buffered)
        temps = 2 * t * C * 4                                 # q_full + acc (f32)
        temps += t * num_heads * Nkv * (4 + 4 + cbytes)       # probs, concat, bf16 copy
        return kv_res_bytes + blocks + temps <= budget

    TN = _pick_tile(N, attn_fits)

    out = pl.pallas_call(
        functools.partial(_attn_kernel, num_heads, hd, cdt),
        out_shape=jax.ShapeDtypeStruct((B, N, C), x.dtype),
        # B is the leading parallel axis: a megacore split lands on batch, so each
        # core keeps its own K/VP block resident instead of duplicating DMAs.
        grid=(B, N // TN),
        in_specs=[
            _spec((1, TN, C), lambda b, t: (b, t, 0)),
            _spec((1, num_heads, hd, Nkv), lambda b, t: (b, 0, 0, 0),
                  single_buffered=True),
            _spec((1, num_heads * Nkv, C), lambda b, t: (b, 0, 0),
                  single_buffered=True),
            _rep(wq_t), _rep(bq_r), _rep(bproj_r),
        ],
        out_specs=pl.BlockSpec((1, TN, C), lambda b, t: (b, t, 0)),
        compiler_params=pltpu.CompilerParams(
            dimension_semantics=("parallel", "parallel"),
            vmem_limit_bytes=vmem_limit),
    )(x, k_all, vp_flat, wq_t, bq_r, bproj_r)
    return out


# --------------------------------------------------------------------------
# Plain-JAX reference mirroring the PyTorch forward exactly
# --------------------------------------------------------------------------
def ref_forward(x, H, W, p, num_heads, sr_ratio):
    B, N, C = x.shape
    hd = C // num_heads
    scale = float(hd) ** -0.5
    q = x @ p['wq'].T + p['bq']
    q = q.reshape(B, N, num_heads, hd).transpose(0, 2, 1, 3)
    if sr_ratio > 1:
        x_ = jnp.transpose(x, (0, 2, 1)).reshape(B, C, H, W)
        x_ = jax.lax.conv_general_dilated(
            x_, p['wsr'], window_strides=(sr_ratio, sr_ratio), padding='VALID',
            dimension_numbers=('NCHW', 'OIHW', 'NCHW'))
        x_ = x_ + p['bsr'][None, :, None, None]
        x_ = x_.reshape(B, C, -1).transpose(0, 2, 1)
        mu = x_.mean(-1, keepdims=True)
        var = ((x_ - mu) ** 2).mean(-1, keepdims=True)
        x_ = (x_ - mu) / jnp.sqrt(var + 1e-5) * p['gamma'] + p['beta']
    else:
        x_ = x
    kv = x_ @ p['wkv'].T + p['bkv']
    Nkv = kv.shape[1]
    kv = kv.reshape(B, Nkv, 2, num_heads, hd).transpose(2, 0, 3, 1, 4)
    k, v = kv[0], kv[1]
    attn = (q @ jnp.swapaxes(k, -2, -1)) * scale
    attn = jax.nn.softmax(attn, axis=-1)
    out = (attn @ v).transpose(0, 2, 1, 3).reshape(B, N, C)
    return out @ p['wproj'].T + p['bproj']


if __name__ == "__main__":
    # H = W = 32 keeps Nkv a multiple of 128 for both sr=2 (Nkv=256) and sr=1
    # (Nkv=1024), matching typical SegFormer stages and the lane-aligned fused-PV path.
    B, C, H, W = 2, 32, 32, 32
    num_heads = 4
    N = H * W
    sr_ratio = 2

    key = jax.random.PRNGKey(0)
    ks = jax.random.split(key, 10)
    init = lambda k, shape: jax.random.normal(k, shape, jnp.float32) * 0.02
    params = {
        'wq': init(ks[0], (C, C)), 'bq': init(ks[1], (C,)),
        'wkv': init(ks[2], (2 * C, C)), 'bkv': init(ks[3], (2 * C,)),
        'wproj': init(ks[4], (C, C)), 'bproj': init(ks[5], (C,)),
        'wsr': init(ks[6], (C, C, sr_ratio, sr_ratio)), 'bsr': init(ks[7], (C,)),
        'gamma': jnp.ones((C,), jnp.float32), 'beta': jnp.zeros((C,), jnp.float32),
    }
    x = jax.random.normal(ks[8], (B, N, C), jnp.float32)

    # bf16 fast path (default) for both structural branches.
    for sr in (sr_ratio, 1):
        out = jax.block_until_ready(
            efficient_self_attention(x, H, W, params, num_heads, sr))
        ref = ref_forward(x, H, W, params, num_heads, sr)
        err = float(jnp.max(jnp.abs(out - ref)))
        assert jnp.allclose(out, ref, atol=5e-3, rtol=5e-2), \
            f"bf16 sr={sr} max |err| = {err}"

    # f32 strict-parity check on the sr>1 branch (conv + LayerNorm path).
    out32 = jax.block_until_ready(
        efficient_self_attention(x, H, W, params, num_heads, sr_ratio,
                                 compute_dtype=jnp.float32))
    ref32 = ref_forward(x, H, W, params, num_heads, sr_ratio)
    err32 = float(jnp.max(jnp.abs(out32 - ref32)))
    assert jnp.allclose(out32, ref32, atol=1e-4, rtol=1e-4), \
        f"f32 sr={sr_ratio} max |err| = {err32}"

    print("KERNEL_OK")
</pallas_src>

<mosaic_0001>
module attributes {stable_mosaic.version = 11 : i64} {
  func.func @_kv_kernel(%arg0: i32, %arg1: i32, %arg2: memref<1x256x128xbf16, #tpu.memory_space<vmem>>, %arg3: memref<128x32xbf16, #tpu.memory_space<vmem>>, %arg4: memref<1x32xf32, #tpu.memory_space<vmem>>, %arg5: memref<1x32xf32, #tpu.memory_space<vmem>>, %arg6: memref<1x32xf32, #tpu.memory_space<vmem>>, %arg7: memref<32x32xbf16, #tpu.memory_space<vmem>>, %arg8: memref<1x32xf32, #tpu.memory_space<vmem>>, %arg9: memref<4x32x32xbf16, #tpu.memory_space<vmem>>, %arg10: memref<4x1x32xf32, #tpu.memory_space<vmem>>, %arg11: memref<1x4x8x256xbf16, #tpu.memory_space<vmem>>, %arg12: memref<1x4x256x32xbf16, #tpu.memory_space<vmem>>) attributes {dimension_semantics = [#tpu.dimension_semantics<parallel>, #tpu.dimension_semantics<parallel>], iteration_bounds = array<i64: 2, 1>, scalar_prefetch = 0 : i64, scratch_operands = 0 : i64, tpu.core_type = #tpu.core_type<tc>, window_params = [{transform_indices = @transform_0, window_bounds = array<i64: 1, 256, 128>}, {pipeline_mode = #tpu.pipeline_mode<synchronous>, transform_indices = @transform_1, window_bounds = array<i64: 128, 32>}, {pipeline_mode = #tpu.pipeline_mode<synchronous>, transform_indices = @transform_2, window_bounds = array<i64: 1, 32>}, {pipeline_mode = #tpu.pipeline_mode<synchronous>, transform_indices = @transform_3, window_bounds = array<i64: 1, 32>}, {pipeline_mode = #tpu.pipeline_mode<synchronous>, transform_indices = @transform_4, window_bounds = array<i64: 1, 32>}, {pipeline_mode = #tpu.pipeline_mode<synchronous>, transform_indices = @transform_5, window_bounds = array<i64: 32, 32>}, {pipeline_mode = #tpu.pipeline_mode<synchronous>, transform_indices = @transform_6, window_bounds = array<i64: 1, 32>}, {pipeline_mode = #tpu.pipeline_mode<synchronous>, transform_indices = @transform_7, window_bounds = array<i64: 4, 32, 32>}, {pipeline_mode = #tpu.pipeline_mode<synchronous>, transform_indices = @transform_8, window_bounds = array<i64: 4, 1, 32>}, {transform_indices = @transform_9, window_bounds = array<i64: 1, 4, 8, 256>}, {transform_indices = @transform_10, window_bounds = array<i64: 1, 4, 256, 32>}]} {
    %c0 = arith.constant 0 : index
    %c0_0 = arith.constant 0 : index
    %c0_1 = arith.constant 0 : index
    %0 = vector.load %arg2[%c0, %c0_0, %c0_1] : memref<1x256x128xbf16, #tpu.memory_space<vmem>>, vector<1x256x128xbf16>
    %1 = vector.shape_cast %0 : vector<1x256x128xbf16> to vector<256x128xbf16>
    %c0_2 = arith.constant 0 : index
    %c0_3 = arith.constant 0 : index
    %2 = vector.load %arg3[%c0_2, %c0_3] : memref<128x32xbf16, #tpu.memory_space<vmem>>, vector<128x32xbf16>
    %cst = arith.constant dense<0.000000e+00> : vector<256x32xf32>
    %3 = tpu.matmul %1, %2, %cst {dimension_numbers = #tpu.dot_dimension_numbers<[1], [0], [0], [1], [0, 0, 1, 1], [], []>} : vector<256x128xbf16>, vector<128x32xbf16>, vector<256x32xf32> -> vector<256x32xf32>
    %c0_4 = arith.constant 0 : index
    %c0_5 = arith.constant 0 : index
    %4 = vector.load %arg4[%c0_4, %c0_5] : memref<1x32xf32, #tpu.memory_space<vmem>>, vector<1x32xf32>
    %5 = vector.broadcast %4 : vector<1x32xf32> to vector<256x32xf32>
    %6 = arith.addf %3, %5 : vector<256x32xf32>
    %cst_6 = arith.constant dense<0.000000e+00> : vector<256xf32>
    %7 = vector.multi_reduction <add>, %6, %cst_6 [1] : vector<256x32xf32> to vector<256xf32>
    %8 = vector.shape_cast %7 : vector<256xf32> to vector<256x1xf32>
    %cst_7 = arith.constant 3.200000e+01 : f32
    %9 = vector.broadcast %cst_7 : f32 to vector<256x1xf32>
    %10 = arith.divf %8, %9 : vector<256x1xf32>
    %11 = vector.broadcast %10 : vector<256x1xf32> to vector<256x32xf32>
    %12 = arith.subf %6, %11 : vector<256x32xf32>
    %13 = arith.mulf %12, %12 : vector<256x32xf32>
    %cst_8 = arith.constant dense<0.000000e+00> : vector<256xf32>
    %14 = vector.multi_reduction <add>, %13, %cst_8 [1] : vector<256x32xf32> to vector<256xf32>
    %15 = vector.shape_cast %14 : vector<256xf32> to vector<256x1xf32>
    %cst_9 = arith.constant 3.200000e+01 : f32
    %16 = vector.broadcast %cst_9 : f32 to vector<256x1xf32>
    %17 = arith.divf %15, %16 : vector<256x1xf32>
    %18 = vector.broadcast %10 : vector<256x1xf32> to vector<256x32xf32>
    %19 = arith.subf %6, %18 : vector<256x32xf32>
    %cst_10 = arith.constant 9.99999974E-6 : f32
    %20 = vector.broadcast %cst_10 : f32 to vector<256x1xf32>
    %21 = arith.addf %17, %20 : vector<256x1xf32>
    %22 = math.rsqrt %21 : vector<256x1xf32>
    %23 = vector.broadcast %22 : vector<256x1xf32> to vector<256x32xf32>
    %24 = arith.mulf %19, %23 : vector<256x32xf32>
    %c0_11 = arith.constant 0 : index
    %c0_12 = arith.constant 0 : index
    %25 = vector.load %arg5[%c0_11, %c0_12] : memref<1x32xf32, #tpu.memory_space<vmem>>, vector<1x32xf32>
    %26 = vector.broadcast %25 : vector<1x32xf32> to vector<256x32xf32>
    %27 = arith.mulf %24, %26 : vector<256x32xf32>
    %c0_13 = arith.constant 0 : index
    %c0_14 = arith.constant 0 : index
    %28 = vector.load %arg6[%c0_13, %c0_14] : memref<1x32xf32, #tpu.memory_space<vmem>>, vector<1x32xf32>
    %29 = vector.broadcast %28 : vector<1x32xf32> to vector<256x32xf32>
    %30 = arith.addf %27, %29 : vector<256x32xf32>
    %31 = arith.truncf %30 : vector<256x32xf32> to vector<256x32xbf16>
    %c0_15 = arith.constant 0 : index
    %c0_16 = arith.constant 0 : index
    %32 = vector.load %arg7[%c0_15, %c0_16] : memref<32x32xbf16, #tpu.memory_space<vmem>>, vector<32x32xbf16>
    %cst_17 = arith.constant dense<0.000000e+00> : vector<256x32xf32>
    %33 = tpu.matmul %31, %32, %cst_17 {dimension_numbers = #tpu.dot_dimension_numbers<[1], [0], [0], [1], [0, 0, 1, 1], [], []>} : vector<256x32xbf16>, vector<32x32xbf16>, vector<256x32xf32> -> vector<256x32xf32>
    %c0_18 = arith.constant 0 : index
    %c0_19 = arith.constant 0 : index
    %34 = vector.load %arg8[%c0_18, %c0_19] : memref<1x32xf32, #tpu.memory_space<vmem>>, vector<1x32xf32>
    %35 = vector.broadcast %34 : vector<1x32xf32> to vector<256x32xf32>
    %36 = arith.addf %33, %35 : vector<256x32xf32>
    %37 = arith.truncf %36 : vector<256x32xf32> to vector<256x32xbf16>
    %38 = tpu.transpose %37, [1, 0] : vector<256x32xbf16> -> vector<32x256xbf16>
    %39 = vector.extract_strided_slice %38 {offsets = [0, 0], sizes = [8, 256], strides = [1, 1]} : vector<32x256xbf16> to vector<8x256xbf16>
    %c0_20 = arith.constant 0 : index
    %c0_21 = arith.constant 0 : index
    %c0_22 = arith.constant 0 : index
    %c0_23 = arith.constant 0 : index
    %40 = vector.load %arg11[%c0_20, %c0_21, %c0_22, %c0_23] : memref<1x4x8x256xbf16, #tpu.memory_space<vmem>>, vector<1x1x8x256xbf16>
    %41 = vector.shape_cast %40 : vector<1x1x8x256xbf16> to vector<8x256xbf16>
    %42 = vector.shape_cast %39 : vector<8x256xbf16> to vector<1x1x8x256xbf16>
    tpu.vector_store %arg11[%c0_20, %c0_21, %c0_22, %c0_23], %42 {strides = array<i32>} : memref<1x4x8x256xbf16, #tpu.memory_space<vmem>>, vector<1x1x8x256xbf16>,
    %43 = vector.extract_strided_slice %38 {offsets = [8, 0], sizes = [8, 256], strides = [1, 1]} : vector<32x256xbf16> to vector<8x256xbf16>
    %c0_24 = arith.constant 0 : index
    %c1 = arith.constant 1 : index
    %c0_25 = arith.constant 0 : index
    %c0_26 = arith.constant 0 : index
    %44 = vector.load %arg11[%c0_24, %c1, %c0_25, %c0_26] : memref<1x4x8x256xbf16, #tpu.memory_space<vmem>>, vector<1x1x8x256xbf16>
    %45 = vector.shape_cast %44 : vector<1x1x8x256xbf16> to vector<8x256xbf16>
    %46 = vector.shape_cast %43 : vector<8x256xbf16> to vector<1x1x8x256xbf16>
    tpu.vector_store %arg11[%c0_24, %c1, %c0_25, %c0_26], %46 {strides = array<i32>} : memref<1x4x8x256xbf16, #tpu.memory_space<vmem>>, vector<1x1x8x256xbf16>,
    %47 = vector.extract_strided_slice %38 {offsets = [16, 0], sizes = [8, 256], strides = [1, 1]} : vector<32x256xbf16> to vector<8x256xbf16>
    %c0_27 = arith.constant 0 : index
    %c2 = arith.constant 2 : index
    %c0_28 = arith.constant 0 : index
    %c0_29 = arith.constant 0 : index
    %48 = vector.load %arg11[%c0_27, %c2, %c0_28, %c0_29] : memref<1x4x8x256xbf16, #tpu.memory_space<vmem>>, vector<1x1x8x256xbf16>
    %49 = vector.shape_cast %48 : vector<1x1x8x256xbf16> to vector<8x256xbf16>
    %50 = vector.shape_cast %47 : vector<8x256xbf16> to vector<1x1x8x256xbf16>
    tpu.vector_store %arg11[%c0_27, %c2, %c0_28, %c0_29], %50 {strides = array<i32>} : memref<1x4x8x256xbf16, #tpu.memory_space<vmem>>, vector<1x1x8x256xbf16>,
    %51 = vector.extract_strided_slice %38 {offsets = [24, 0], sizes = [8, 256], strides = [1, 1]} : vector<32x256xbf16> to vector<8x256xbf16>
    %c0_30 = arith.constant 0 : index
    %c3 = arith.constant 3 : index
    %c0_31 = arith.constant 0 : index
    %c0_32 = arith.constant 0 : index
    %52 = vector.load %arg11[%c0_30, %c3, %c0_31, %c0_32] : memref<1x4x8x256xbf16, #tpu.memory_space<vmem>>, vector<1x1x8x256xbf16>
    %53 = vector.shape_cast %52 : vector<1x1x8x256xbf16> to vector<8x256xbf16>
    %54 = vector.shape_cast %51 : vector<8x256xbf16> to vector<1x1x8x256xbf16>
    tpu.vector_store %arg11[%c0_30, %c3, %c0_31, %c0_32], %54 {strides = array<i32>} : memref<1x4x8x256xbf16, #tpu.memory_space<vmem>>, vector<1x1x8x256xbf16>,
    %c0_33 = arith.constant 0 : index
    %c0_34 = arith.constant 0 : index
    %c0_35 = arith.constant 0 : index
    %55 = vector.load %arg9[%c0_33, %c0_34, %c0_35] : memref<4x32x32xbf16, #tpu.memory_space<vmem>>, vector<1x32x32xbf16>
    %56 = vector.shape_cast %55 : vector<1x32x32xbf16> to vector<32x32xbf16>
    %cst_36 = arith.constant dense<0.000000e+00> : vector<256x32xf32>
    %57 = tpu.matmul %31, %56, %cst_36 {dimension_numbers = #tpu.dot_dimension_numbers<[1], [0], [0], [1], [0, 0, 1, 1], [], []>} : vector<256x32xbf16>, vector<32x32xbf16>, vector<256x32xf32> -> vector<256x32xf32>
    %c0_37 = arith.constant 0 : index
    %c0_38 = arith.constant 0 : index
    %c0_39 = arith.constant 0 : index
    %58 = vector.load %arg10[%c0_37, %c0_38, %c0_39] : memref<4x1x32xf32, #tpu.memory_space<vmem>>, vector<1x1x32xf32>
    %59 = vector.shape_cast %58 : vector<1x1x32xf32> to vector<1x32xf32>
    %60 = vector.broadcast %59 : vector<1x32xf32> to vector<256x32xf32>
    %61 = arith.addf %57, %60 : vector<256x32xf32>
    %62 = arith.truncf %61 : vector<256x32xf32> to vector<256x32xbf16>
    %c0_40 = arith.constant 0 : index
    %c0_41 = arith.constant 0 : index
    %c0_42 = arith.constant 0 : index
    %c0_43 = arith.constant 0 : index
    %63 = vector.load %arg12[%c0_40, %c0_41, %c0_42, %c0_43] : memref<1x4x256x32xbf16, #tpu.memory_space<vmem>>, vector<1x1x256x32xbf16>
    %64 = vector.shape_cast %63 : vector<1x1x256x32xbf16> to vector<256x32xbf16>
    %65 = vector.shape_cast %62 : vector<256x32xbf16> to vector<1x1x256x32xbf16>
    tpu.vector_store %arg12[%c0_40, %c0_41, %c0_42, %c0_43], %65 {strides = array<i32>} : memref<1x4x256x32xbf16, #tpu.memory_space<vmem>>, vector<1x1x256x32xbf16>,
    %c1_44 = arith.constant 1 : index
    %c0_45 = arith.constant 0 : index
    %c0_46 = arith.constant 0 : index
    %66 = vector.load %arg9[%c1_44, %c0_45, %c0_46] : memref<4x32x32xbf16, #tpu.memory_space<vmem>>, vector<1x32x32xbf16>
    %67 = vector.shape_cast %66 : vector<1x32x32xbf16> to vector<32x32xbf16>
    %cst_47 = arith.constant dense<0.000000e+00> : vector<256x32xf32>
    %68 = tpu.matmul %31, %67, %cst_47 {dimension_numbers = #tpu.dot_dimension_numbers<[1], [0], [0], [1], [0, 0, 1, 1], [], []>} : vector<256x32xbf16>, vector<32x32xbf16>, vector<256x32xf32> -> vector<256x32xf32>
    %c1_48 = arith.constant 1 : index
    %c0_49 = arith.constant 0 : index
    %c0_50 = arith.constant 0 : index
    %69 = vector.load %arg10[%c1_48, %c0_49, %c0_50] : memref<4x1x32xf32, #tpu.memory_space<vmem>>, vector<1x1x32xf32>
    %70 = vector.shape_cast %69 : vector<1x1x32xf32> to vector<1x32xf32>
    %71 = vector.broadcast %70 : vector<1x32xf32> to vector<256x32xf32>
    %72 = arith.addf %68, %71 : vector<256x32xf32>
    %73 = arith.truncf %72 : vector<256x32xf32> to vector<256x32xbf16>
    %c0_51 = arith.constant 0 : index
    %c1_52 = arith.constant 1 : index
    %c0_53 = arith.constant 0 : index
    %c0_54 = arith.constant 0 : index
    %74 = vector.load %arg12[%c0_51, %c1_52, %c0_53, %c0_54] : memref<1x4x256x32xbf16, #tpu.memory_space<vmem>>, vector<1x1x256x32xbf16>
    %75 = vector.shape_cast %74 : vector<1x1x256x32xbf16> to vector<256x32xbf16>
    %76 = vector.shape_cast %73 : vector<256x32xbf16> to vector<1x1x256x32xbf16>
    tpu.vector_store %arg12[%c0_51, %c1_52, %c0_53, %c0_54], %76 {strides = array<i32>} : memref<1x4x256x32xbf16, #tpu.memory_space<vmem>>, vector<1x1x256x32xbf16>,
    %c2_55 = arith.constant 2 : index
    %c0_56 = arith.constant 0 : index
    %c0_57 = arith.constant 0 : index
    %77 = vector.load %arg9[%c2_55, %c0_56, %c0_57] : memref<4x32x32xbf16, #tpu.memory_space<vmem>>, vector<1x32x32xbf16>
    %78 = vector.shape_cast %77 : vector<1x32x32xbf16> to vector<32x32xbf16>
    %cst_58 = arith.constant dense<0.000000e+00> : vector<256x32xf32>
    %79 = tpu.matmul %31, %78, %cst_58 {dimension_numbers = #tpu.dot_dimension_numbers<[1], [0], [0], [1], [0, 0, 1, 1], [], []>} : vector<256x32xbf16>, vector<32x32xbf16>, vector<256x32xf32> -> vector<256x32xf32>
    %c2_59 = arith.constant 2 : index
    %c0_60 = arith.constant 0 : index
    %c0_61 = arith.constant 0 : index
    %80 = vector.load %arg10[%c2_59, %c0_60, %c0_61] : memref<4x1x32xf32, #tpu.memory_space<vmem>>, vector<1x1x32xf32>
    %81 = vector.shape_cast %80 : vector<1x1x32xf32> to vector<1x32xf32>
    %82 = vector.broadcast %81 : vector<1x32xf32> to vector<256x32xf32>
    %83 = arith.addf %79, %82 : vector<256x32xf32>
    %84 = arith.truncf %83 : vector<256x32xf32> to vector<256x32xbf16>
    %c0_62 = arith.constant 0 : index
    %c2_63 = arith.constant 2 : index
    %c0_64 = arith.constant 0 : index
    %c0_65 = arith.constant 0 : index
    %85 = vector.load %arg12[%c0_62, %c2_63, %c0_64, %c0_65] : memref<1x4x256x32xbf16, #tpu.memory_space<vmem>>, vector<1x1x256x32xbf16>
    %86 = vector.shape_cast %85 : vector<1x1x256x32xbf16> to vector<256x32xbf16>
    %87 = vector.shape_cast %84 : vector<256x32xbf16> to vector<1x1x256x32xbf16>
    tpu.vector_store %arg12[%c0_62, %c2_63, %c0_64, %c0_65], %87 {strides = array<i32>} : memref<1x4x256x32xbf16, #tpu.memory_space<vmem>>, vector<1x1x256x32xbf16>,
    %c3_66 = arith.constant 3 : index
    %c0_67 = arith.constant 0 : index
    %c0_68 = arith.constant 0 : index
    %88 = vector.load %arg9[%c3_66, %c0_67, %c0_68] : memref<4x32x32xbf16, #tpu.memory_space<vmem>>, vector<1x32x32xbf16>
    %89 = vector.shape_cast %88 : vector<1x32x32xbf16> to vector<32x32xbf16>
    %cst_69 = arith.constant dense<0.000000e+00> : vector<256x32xf32>
    %90 = tpu.matmul %31, %89, %cst_69 {dimension_numbers = #tpu.dot_dimension_numbers<[1], [0], [0], [1], [0, 0, 1, 1], [], []>} : vector<256x32xbf16>, vector<32x32xbf16>, vector<256x32xf32> -> vector<256x32xf32>
    %c3_70 = arith.constant 3 : index
    %c0_71 = arith.constant 0 : index
    %c0_72 = arith.constant 0 : index
    %91 = vector.load %arg10[%c3_70, %c0_71, %c0_72] : memref<4x1x32xf32, #tpu.memory_space<vmem>>, vector<1x1x32xf32>
    %92 = vector.shape_cast %91 : vector<1x1x32xf32> to vector<1x32xf32>
    %93 = vector.broadcast %92 : vector<1x32xf32> to vector<256x32xf32>
    %94 = arith.addf %90, %93 : vector<256x32xf32>
    %95 = arith.truncf %94 : vector<256x32xf32> to vector<256x32xbf16>
    %c0_73 = arith.constant 0 : index
    %c3_74 = arith.constant 3 : index
    %c0_75 = arith.constant 0 : index
    %c0_76 = arith.constant 0 : index
    %96 = vector.load %arg12[%c0_73, %c3_74, %c0_75, %c0_76] : memref<1x4x256x32xbf16, #tpu.memory_space<vmem>>, vector<1x1x256x32xbf16>
    %97 = vector.shape_cast %96 : vector<1x1x256x32xbf16> to vector<256x32xbf16>
    %98 = vector.shape_cast %95 : vector<256x32xbf16> to vector<1x1x256x32xbf16>
    tpu.vector_store %arg12[%c0_73, %c3_74, %c0_75, %c0_76], %98 {strides = array<i32>} : memref<1x4x256x32xbf16, #tpu.memory_space<vmem>>, vector<1x1x256x32xbf16>,
    return
  }
  func.func @transform_0(%arg0: i32, %arg1: i32) -> (i32, i32, i32) {
    %c0_i32 = arith.constant 0 : i32
    %c0_i32_0 = arith.constant 0 : i32
    return %arg0, %arg1, %c0_i32 : i32, i32, i32
  }
  func.func @transform_1(%arg0: i32, %arg1: i32) -> (i32, i32) {
    %c0_i32 = arith.constant 0 : i32
    %c0_i32_0 = arith.constant 0 : i32
    %c0_i32_1 = arith.constant 0 : i32
    return %c0_i32, %c0_i32_0 : i32, i32
  }
  func.func @transform_2(%arg0: i32, %arg1: i32) -> (i32, i32) {
    %c0_i32 = arith.constant 0 : i32
    %c0_i32_0 = arith.constant 0 : i32
    %c0_i32_1 = arith.constant 0 : i32
    return %c0_i32, %c0_i32_0 : i32, i32
  }
  func.func @transform_3(%arg0: i32, %arg1: i32) -> (i32, i32) {
    %c0_i32 = arith.constant 0 : i32
    %c0_i32_0 = arith.constant 0 : i32
    %c0_i32_1 = arith.constant 0 : i32
    return %c0_i32, %c0_i32_0 : i32, i32
  }
  func.func @transform_4(%arg0: i32, %arg1: i32) -> (i32, i32) {
    %c0_i32 = arith.constant 0 : i32
    %c0_i32_0 = arith.constant 0 : i32
    %c0_i32_1 = arith.constant 0 : i32
    return %c0_i32, %c0_i32_0 : i32, i32
  }
  func.func @transform_5(%arg0: i32, %arg1: i32) -> (i32, i32) {
    %c0_i32 = arith.constant 0 : i32
    %c0_i32_0 = arith.constant 0 : i32
    %c0_i32_1 = arith.constant 0 : i32
    return %c0_i32, %c0_i32_0 : i32, i32
  }
  func.func @transform_6(%arg0: i32, %arg1: i32) -> (i32, i32) {
    %c0_i32 = arith.constant 0 : i32
    %c0_i32_0 = arith.constant 0 : i32
    %c0_i32_1 = arith.constant 0 : i32
    return %c0_i32, %c0_i32_0 : i32, i32
  }
  func.func @transform_7(%arg0: i32, %arg1: i32) -> (i32, i32, i32) {
    %c0_i32 = arith.constant 0 : i32
    %c0_i32_0 = arith.constant 0 : i32
    %c0_i32_1 = arith.constant 0 : i32
    %c0_i32_2 = arith.constant 0 : i32
    return %c0_i32, %c0_i32_0, %c0_i32_1 : i32, i32, i32
  }
  func.func @transform_8(%arg0: i32, %arg1: i32) -> (i32, i32, i32) {
    %c0_i32 = arith.constant 0 : i32
    %c0_i32_0 = arith.constant 0 : i32
    %c0_i32_1 = arith.constant 0 : i32
    %c0_i32_2 = arith.constant 0 : i32
    return %c0_i32, %c0_i32_0, %c0_i32_1 : i32, i32, i32
  }
  func.func @transform_9(%arg0: i32, %arg1: i32) -> (i32, i32, i32, i32) {
    %c0_i32 = arith.constant 0 : i32
    %c0_i32_0 = arith.constant 0 : i32
    %c0_i32_1 = arith.constant 0 : i32
    return %arg0, %c0_i32, %c0_i32_0, %arg1 : i32, i32, i32, i32
  }
  func.func @transform_10(%arg0: i32, %arg1: i32) -> (i32, i32, i32, i32) {
    %c0_i32 = arith.constant 0 : i32
    %c0_i32_0 = arith.constant 0 : i32
    %c0_i32_1 = arith.constant 0 : i32
    return %arg0, %c0_i32, %arg1, %c0_i32_0 : i32, i32, i32, i32
  }
}

</mosaic_0001>

<bundles_post_ra>
// kernel: tpu_custom_call.1
= control target key start
LH: loop header
LB: loop body
LE: loop exit
PB: predicated region body
PF: predicated region fallthrough
CT: control target
= control target key end

     0   :  { %16 = vsyncpa [#allocation3], 0  ;;  %s5699_s0 = inlined_call_operand.hbm [shape: bf16[2,256,128], index: 0, kind: input, shape index: {}]   ;;  %s5700_s1 = inlined_call_operand.vmem [shape: bf16[128,32], index: 1, kind: input, shape index: {}]   ;;  %s5701_s2 = inlined_call_operand.vmem [shape: f32[1,32], index: 2, kind: input, shape index: {}]   ;;  %s5702_s3 = inlined_call_operand.vmem [shape: f32[1,32], index: 3, kind: input, shape index: {}]   ;;  %s5703_s4 = inlined_call_operand.vmem [shape: f32[1,32], index: 4, kind: input, shape index: {}]   ;;  %s5704_s5 = inlined_call_operand.vmem [shape: bf16[32,32], index: 5, kind: input, shape index: {}]   ;;  %s5705_s6 = inlined_call_operand.vmem [shape: f32[1,32], index: 6, kind: input, shape index: {}]   ;;  %s5706_s7 = inlined_call_operand.vmem [shape: bf16[4,32,32], index: 7, kind: input, shape index: {}]   ;;  %s5707_s8 = inlined_call_operand.vmem [shape: f32[4,1,32], index: 8, kind: input, shape index: {}]   ;;  %s5708_s9 = inlined_call_operand.hbm [shape: bf16[2,4,8,256], index: 9, kind: output, shape index: {0}]   ;;  %s5709_s10 = inlined_call_operand.vmem [shape: bf16[2,4,256,32], index: 10, kind: output, shape index: {1}]  }
   0x1   :  { %18 = vsyncpa [#allocation3 + $0x1], 0 }
   0x2   :  { %19 = vsyncpa [#allocation4], 0 }
   0x3   :  { %21 = vsyncpa [#allocation4 + $0x1], 0  ;;  %s4342_s13 = smov 0   ;;  %s4344_s14 = smov 0  }
   0x4   :  { %s4346_s15 = smov 0   ;;  %s4348_s16 = smov 0  }
   0x5   :  { %s4350_s17 = smov 0   ;;  %s4352_s18 = smov 0  }
   0x6 LB: > { %5713 = sst [smem:[#allocation8_spill]] %s4275_s17  ;;  %s3141_s19 = sadd.s32 4294967295, %s4279_s18   ;;  %s4279_s18 = sphi %s4352_s18, %s27_s18   ;;  %s4275_s17 = sphi %s4350_s17, %s5725_s17   ;;  %s4271_s16 = sphi %s4348_s16, %s5724_s16   ;;  %s4267_s15 = sphi %s4346_s15, %s5728_s15   ;;  %s4263_s14 = sphi %s4344_s14, %s5727_s14   ;;  %s4259_s13 = sphi %s4342_s13, %s5726_s13  }
   0x7   : > { %s3142_s20 = sadd.s32 4294967294, %s4279_s18   ;;  %s39_s21 = sadd.s32 1, %s4275_s17 }
   0x8   : > { %s48_s22 = sadd.s32 1, %s4267_s15  ;;  %p41_p0 = scmp.ge.s32.totalorder %s39_s21, 2 }
   0x9   : > { %p55_p1 = scmp.ne.s32.totalorder %s4267_s15, %s4263_s14  ;;  %p56_p2 = scmp.eq.s32.totalorder %s4279_s18, 0 }
   0xa   : > { %p61_p3 = scmp.ne.s32.totalorder %s4263_s14, %s4259_s13  ;;  %s5730_s21 = smov (%p41_p0, %s39_s21), 0 }
   0xb   : > { %5714 = sst [smem:[#allocation9_spill]] %s5730_s21  ;;  %p4383_p4 = por %p56_p2, %p55_p1 }
   0xc   : > { %p62_p5 = scmp.eq.s32.totalorder %s3141_s19, 0  ;;  %s43_s24 = ssub.s32 %s4275_s17, %s5730_s21 }
   0xd   : > { %p255_p6 = scmp.eq.s32.totalorder %s3141_s19, 1  ;;  %p46_p7 = scmp.eq.s32.totalorder %s43_s24, 0 }
   0xe   : > { %p4389_p8 = por %p62_p5, %p61_p3  ;;  %p261_p10 = scmp.eq.s32.totalorder %s3142_s20, 1 }
   0xf   : > { %p4393_p9 = por %p255_p6, %p55_p1  ;;  %p4015_p13 = scmp.lt.s32.totalorder %s4279_s18, 2 }
  0x10   : > { %s4398_s27 = scalar_select %p46_p7, %s4267_s15, %s48_s22  }
  0x11   : > { %s5717_s26 = scalar_select %p4393_p9, 1, 0 }
  0x12   : > { %p4400_p11 = por %p261_p10, %p61_p3  ;;  %s333_s29 = sand.u32 1, %s4267_s15  }
  0x13   : > { %s3145_s30 = sshll.u32 %s333_s29, 7  ;;  %s3526_s11 = sshll.u32 %s4275_s17, 11 }
  0x14   : > { %s5718_s28 = scalar_select %p4400_p11, 1, 0 }
  0x15   : > { %s4411_s24 = scalar_lea.hbm %s5699_s0, %s3526_s11  ;;  %s337_s20 = scalar_lea.vmem [#allocation2], %s3145_s30 }
  0x16   : > { %s346_s22 = sshll.u32 %s337_s20, 4  ;;  %p4417_p0 = pnand %p4015_p13, %p4383_p4  ;;  %s4413_s22 = int_to_ptr.vmem [resolvable:$true] %s346_s22 }
  0x17   : > { %s4422_s17 = scalar_lea.sflag [#allocation3], %s333_s29  ;;  %s4167_s11 = scalar_lea.hbm %s4411_s24, 2048 }
  0x18   : > { %p4168_p2 = scmp.ne.s32.totalorder %s4411_s24, %s4167_s11  ;;  %p4169_p3 = pneg %p4417_p0 }
  0x19   : > { %s4172_s23 = scalar_lea.hbm %s5699_s0, 4096  ;;  %p4173_p4 = scmp.lt.u32.totalorder %s4411_s24, %s5699_s0 }
  0x1a   : > { %p4170_p5 = pnand %p4169_p3, %p4168_p2  ;;  %p4174_p7 = scmp.lt.u32.totalorder %s4172_s23, %s4167_s11 }
  0x1b   : > { %p4176_p13 = scmp.lt.u32.totalorder %s4167_s11, %s4411_s24 }
  0x1c   : > { %p4171_p6 = pneg %p4170_p5  ;;  %p4175_p10 = por %p4174_p7, %p4173_p4 }
  0x1e   : > { %p4177_p12 = por %p4176_p13, %p4175_p10 }
  0x20   : > { %p4178_p1 = pnand %p4177_p12, %p4171_p6 }
  0x22   : > { %4181 = shalt.err (!%p4178_p1)
}
  0x23   : > { %s4182_s29 = scalar_lea.vmem %s4413_s22, 2048  ;;  %s4281_s30 = smov [#allocation2]  }
  0x24   : > { %p4183_p2 = scmp.ne.s32.totalorder %s4413_s22, %s4182_s29  ;;  %s4187_s12 = sshll.u32 %s4281_s30, 4  ;;  %s4188_s12 = int_to_ptr.vmem [resolvable:$false] %s4187_s12 }
  0x25   : > { %s4189_s19 = scalar_lea.vmem %s4188_s12, 4096  ;;  %p4190_p9 = scmp.lt.s32.totalorder %s4413_s22, %s4188_s12 }
  0x26   : > { %p4185_p5 = pnand %p4183_p2, %p4169_p3  ;;  %p4191_p4 = scmp.lt.s32.totalorder %s4189_s19, %s4182_s29 }
  0x28   : > { %p4186_p11 = pneg %p4185_p5  ;;  %p4192_p7 = por %p4191_p4, %p4190_p9 }
  0x2a   : > { %p4193_p10 = pnand %p4192_p7, %p4186_p11 }
  0x2c   : > { %4196 = shalt.err (!%p4193_p10)
}
  0x2d   : > { %s4282_s11 = smov 64   ;;  %s4283_s23 = smov 4  }
  0x2e   : > { %4010 = dma.hbm_to_vmem [thread:$0]  (!%p4417_p0), %s4411_s24, 2048, %s4413_s22, %s4422_s17, %s4282_s11, %s4282_s11, %s4283_s23  }
  0x2f   : > { %p354_p12 = scmp.lt.s32.totalorder %s4279_s18, 3  ;;  %p5720_p1 = scmp.ge.s32.totalorder %s4279_s18, 1 }
  0x31   : > { %p355_p3 = pnand %p5720_p1, %p354_p12 }
  0x32   : > { %s4454_s20 = sand.u32 (!%p355_p3), 1, %s4263_s14  }
  0x33   : > { %358 = sbr.rel (%p355_p3) target bundleno = 1042 (0x412), region = 56  ;;  %s3149_s29 = sshll.u32 (!%p355_p3), %s4454_s20, 7 }
  0x34   : > { %s361_s30 = scalar_lea.sflag (!%p355_p3), [#allocation3], %s4454_s20  ;;  %s4458_s12 = scalar_lea.vmem (!%p355_p3), [#allocation2], %s3149_s29 }
  0x3a   : > { %4250 = dma.done.wait (%p4389_p8), %s361_s30, 2048  }
  0x3b   : > { %4252 = vsyncadd (%p4389_p8), %s361_s30, 4294965248  ;;  %v4069_v0 = vld [vmem:[%s5700_s1] sm:$0xff]   ;;  %v4070_v1 = vld [vmem:[%s5700_s1 + $0x8] sm:$0xff]   ;;  %vm783_vm0 = vcmask 261120   ;;  %p413_p8 = scmp.lt.s32.totalorder %s4271_s16, 1  ;;  %vm1914_vm1 = vcmask 257024  }
  0x3c   : > { %3771 = vmatprep.subr.bf16.mxu0 %v4069_v0  ;;  %v4071_v2 = vld [vmem:[%s5700_s1 + $0x10] sm:$0xff]   ;;  %v4072_v3 = vld [vmem:[%s5700_s1 + $0x18] sm:$0xff]   ;;  %v4077_v4 = vld [vmem:[%s4458_s12] sm:$0xff]   ;;  %s3150_s22 = sshll.u32 %s4454_s20, 5  ;;  %s3656_s23 = sshll.u32 %s4271_s16, 9 }
  0x3d   : > { %3772 = vmatpush3.bf16.msra.mxu0 %v4069_v0  ;;  %3787 = vmatprep.mubr.bf16.mxu0 %v4077_v4  ;;  %v4073_v5 = vld [vmem:[%s5700_s1 + $0x20] sm:$0xff]   ;;  %v4074_v6 = vld [vmem:[%s5700_s1 + $0x28] sm:$0xff]   ;;  %v4075_v7 = vld [vmem:[%s5700_s1 + $0x30] sm:$0xff]   ;;  %s414_s30 = scalar_select %p413_p8, %s4271_s16, 1 }
  0x3e   : > { %3773 = vmatprep.subr.bf16.mxu0 %v4070_v1  ;;  %v4076_v8 = vld [vmem:[%s5700_s1 + $0x38] sm:$0xff]   ;;  %v4078_v9 = vld [vmem:[%s4458_s12 + $0x8] sm:$0xff]   ;;  %v4079_v10 = vld [vmem:[%s4458_s12 + $0x10] sm:$0xff]   ;;  %s398_s19 = scalar_lea.vmem [#allocation5], %s3150_s22  ;;  %s5568_s29 = scalar_lea.hbm %s5708_s9, %s3656_s23 }
  0x3f   : > { %v4080_v11 = vld [vmem:[%s4458_s12 + $0x18] sm:$0xff]   ;;  %v4081_v12 = vld [vmem:[%s4458_s12 + $0x20] sm:$0xff]   ;;  %v4082_v13 = vld [vmem:[%s4458_s12 + $0x28] sm:$0xff]   ;;  %s3527_s24 = sshll.u32 %s414_s30, 9  ;;  %s3013_s11 = sshll.u32 %s398_s19, 4  ;;  %s5562_s11 = int_to_ptr.vmem [resolvable:$true] %s3013_s11 }
  0x40   : > { %v4083_v14 = vld [vmem:[%s4458_s12 + $0x30] sm:$0xff]   ;;  %v4084_v15 = vld [vmem:[%s4458_s12 + $0x38] sm:$0xff]   ;;  %v4085_v16 = vld [vmem:[%s4458_s12 + $0x40] sm:$0xff]   ;;  %s5211_s25 = scalar_lea.vmem %s5709_s10, %s3527_s24  ;;  %s2989_s30 = scalar_lea.sflag [#allocation4], %s4454_s20 }
  0x41   : > { %3774 = vmatpush3.bf16.msra.mxu0 %v4070_v1  ;;  %v4086_v17 = vld [vmem:[%s4458_s12 + $0x48] sm:$0xff]   ;;  %v4087_v18 = vld [vmem:[%s4458_s12 + $0x50] sm:$0xff]   ;;  %v4088_v19 = vld [vmem:[%s4458_s12 + $0x58] sm:$0xff]   ;;  %s4197_s17 = scalar_lea.vmem %s5562_s11, 512  ;;  %p5721_p11 = scmp.ne.s32.totalorder %s5717_s26, 0 }
  0x42   : > { %3775 = vmatprep.subr.bf16.mxu0 %v4071_v2  ;;  %v4089_v20 = vld [vmem:[%s4458_s12 + $0x60] sm:$0xff]   ;;  %v4090_v21 = vld [vmem:[%s4458_s12 + $0x68] sm:$0xff]   ;;  %v4091_v22 = vld [vmem:[%s4458_s12 + $0x70] sm:$0xff]   ;;  %p4198_p9 = scmp.ne.s32.totalorder %s5562_s11, %s4197_s17  ;;  %s4284_s21 = smov [#allocation5]  }
  0x43   : > { %v4092_v23 = vld [vmem:[%s4458_s12 + $0x78] sm:$0xff]   ;;  %v4507_v24 = vld [vmem:[%s5701_s2] ss:$0 sm:$0xff]  ;;  %s4201_s24 = sshll.u32 %s4284_s21, 4  ;;  %s4202_s24 = int_to_ptr.vmem [resolvable:$false] %s4201_s24 }
  0x44   : > { %p4199_p0 = pnand %p4198_p9, %p5721_p11  ;;  %s4203_s22 = scalar_lea.vmem %s4202_s24, 1024 }
  0x45   : > { %3776 = vmatpush3.bf16.msra.mxu0 %v4071_v2  ;;  %p4204_p13 = scmp.lt.s32.totalorder %s5562_s11, %s4202_s24  ;;  %p4205_p2 = scmp.lt.s32.totalorder %s4203_s22, %s4197_s17 }
  0x46   : > { %3777 = vmatprep.subr.bf16.mxu0 %v4072_v3  ;;  %p4200_p6 = pneg %p4199_p0 }
  0x47   : > { %p4206_p5 = por %p4205_p2, %p4204_p13 }
  0x49   : > { %3778 = vmatpush3.bf16.msra.mxu0 %v4072_v3  ;;  %p4207_p4 = pnand %p4206_p5, %p4200_p6 }
  0x4a   : > { %3779 = vmatprep.subr.bf16.mxu0 %v4073_v5 }
  0x4d   : > { %3780 = vmatpush3.bf16.msra.mxu0 %v4073_v5 }
  0x4e   : > { %3781 = vmatprep.subr.bf16.mxu0 %v4074_v6 }
  0x51   : > { %3782 = vmatpush3.bf16.msra.mxu0 %v4074_v6 }
  0x52   : > { %3783 = vmatprep.subr.bf16.mxu0 %v4075_v7 }
  0x55   : > { %3784 = vmatpush3.bf16.msra.mxu0 %v4075_v7 }
  0x56   : > { %3785 = vmatprep.subr.bf16.mxu0 %v4076_v8 }
  0x59   : > { %3786 = vmatpush3.bf16.msra.mxu0 %v4076_v8 }
  0x5c   : > { %3788 = vmatmul.mubr.bf16.vlgmr.msra.gmra.mrb[0].mxu0 %v4078_v9 }
  0x5d   : > { %3791 = vmatprep.mubr.bf16.mxu0 %v4079_v10 }
  0x64   : > { %3792 = vmatmul.mubr.bf16.gmra.mrb[4].mxu0 %v4080_v11 }
  0x65   : > { %3795 = vmatprep.mubr.bf16.mxu0 %v4081_v12 }
  0x6c   : > { %3796 = vmatmul.mubr.bf16.gmra.mrb[8].mxu0 %v4082_v13 }
  0x6d   : > { %3799 = vmatprep.mubr.bf16.mxu0 %v4083_v14 }
  0x74   : > { %3800 = vmatmul.mubr.bf16.gmra.mrb[12].mxu0 %v4084_v15 }
  0x75   : > { %3803 = vmatprep.mubr.bf16.mxu0 %v4085_v16 }
  0x7c   : > { %3804 = vmatmul.mubr.bf16.gmra.mrb[16].mxu0 %v4086_v17 }
  0x7d   : > { %3807 = vmatprep.mubr.bf16.mxu0 %v4087_v18 }
  0x84   : > { %3808 = vmatmul.mubr.bf16.gmra.mrb[20].mxu0 %v4088_v19 }
  0x85   : > { %3811 = vmatprep.mubr.bf16.mxu0 %v4089_v20 }
  0x8c   : > { %3812 = vmatmul.mubr.bf16.gmra.mrb[24].mxu0 %v4090_v21 }
  0x8d   : > { %3815 = vmatprep.mubr.bf16.mxu0 %v4091_v22 }
  0x94   : > { %3816 = vmatmul.mubr.bf16.gmra.mrb[28].mxu0 %v4092_v23 }
 0x12f   : > { %v3789_v25 = vpop.f32.mrb[0].mxu0 }
 0x130   : > { %v4510_v26 = vadd.f32 %v3789_v25, %v4507_v24  ;;  %v656_v27 = vpop.f32.mrb[1].mxu0 }
 0x131   : > { %v4513_v28 = vadd.f32 %v4507_v24, %v656_v27  ;;  %v3790_v29 = vpop.f32.mrb[2].mxu0 }
 0x132   : > { %v4516_v30 = vadd.f32 %v3790_v29, %v4507_v24  ;;  %v659_v31 = vpop.f32.mrb[3].mxu0  ;;  %v790_v32 = vsel %vm783_vm0, %v4510_v26, 0.0 }
 0x133   : > { %v4521_v33 = vadd.f32 %v4507_v24, %v659_v31  ;;  %791 = vadd.xlane.f32.xlu1 %v790_v32  ;;  %v784_v34 = vsel %vm783_vm0, %v4513_v28, 0.0 }
 0x134   : > { %785 = vadd.xlane.f32.xlu0 %v784_v34  ;;  %v793_v35 = vsel %vm783_vm0, %v4516_v30, 0.0 }
 0x135   : > { %v787_v37 = vsel %vm783_vm0, %v4521_v33, 0.0 }
 0x137   : > { %794 = vadd.xlane.f32.xlu1 %v793_v35  ;;  %v3793_v36 = vpop.f32.mrb[4].mxu0 }
 0x138   : > { %v672_v38 = vpop.f32.mrb[5].mxu0  ;;  %788 = vadd.xlane.f32.xlu0 %v787_v37  ;;  %v4533_v42 = vadd.f32 %v3793_v36, %v4507_v24 }
 0x139   : > { %v4530_v39 = vadd.f32 %v4507_v24, %v672_v38  ;;  %v3794_v40 = vpop.f32.mrb[6].mxu0 }
 0x13a   : > { %v675_v41 = vpop.f32.mrb[7].mxu0  ;;  %v4541_v45 = vadd.f32 %v3794_v40, %v4507_v24  ;;  %v802_v48 = vsel %vm783_vm0, %v4533_v42, 0.0 }
 0x13b   : > { %v4536_v43 = vadd.f32 %v4507_v24, %v675_v41  ;;  %v796_v44 = vsel %vm783_vm0, %v4530_v39, 0.0 }
 0x13c   : > { %797 = vadd.xlane.f32.xlu0 %v796_v44  ;;  %v805_v52 = vsel %vm783_vm0, %v4541_v45, 0.0 }
 0x13d   : > { %v799_v46 = vsel %vm783_vm0, %v4536_v43, 0.0 }
 0x13e   : > { %800 = vadd.xlane.f32.xlu1 %v799_v46 }
 0x13f   : > { %v3797_v47 = vpop.f32.mrb[8].mxu0 }
 0x140   : > { %v688_v49 = vpop.f32.mrb[9].mxu0  ;;  %803 = vadd.xlane.f32.xlu0 %v802_v48  ;;  %v4553_v54 = vadd.f32 %v3797_v47, %v4507_v24 }
 0x141   : > { %v4548_v50 = vadd.f32 %v4507_v24, %v688_v49  ;;  %v3798_v51 = vpop.f32.mrb[10].mxu0 }
 0x142   : > { %v691_v53 = vpop.f32.mrb[11].mxu0  ;;  %806 = vadd.xlane.f32.xlu1 %v805_v52  ;;  %v4561_v57 = vadd.f32 %v3798_v51, %v4507_v24  ;;  %v814_v60 = vsel %vm783_vm0, %v4553_v54, 0.0 }
 0x143   : > { %v4556_v55 = vadd.f32 %v4507_v24, %v691_v53  ;;  %v808_v56 = vsel %vm783_vm0, %v4548_v50, 0.0 }
 0x144   : > { %809 = vadd.xlane.f32.xlu0 %v808_v56  ;;  %v817_v0 = vsel %vm783_vm0, %v4561_v57, 0.0 }
 0x145   : > { %v811_v58 = vsel %vm783_vm0, %v4556_v55, 0.0 }
 0x146   : > { %812 = vadd.xlane.f32.xlu1 %v811_v58 }
 0x147   : > { %v3801_v59 = vpop.f32.mrb[12].mxu0 }
 0x148   : > { %v704_v61 = vpop.f32.mrb[13].mxu0  ;;  %815 = vadd.xlane.f32.xlu0 %v814_v60  ;;  %v4573_v2 = vadd.f32 %v3801_v59, %v4507_v24 }
 0x149   : > { %v4568_v62 = vadd.f32 %v4507_v24, %v704_v61  ;;  %v3802_v63 = vpop.f32.mrb[14].mxu0 }
 0x14a   : > { %v707_v1 = vpop.f32.mrb[15].mxu0  ;;  %818 = vadd.xlane.f32.xlu1 %v817_v0  ;;  %v4581_v5 = vadd.f32 %v3802_v63, %v4507_v24  ;;  %v826_v8 = vsel %vm783_vm0, %v4573_v2, 0.0 }
 0x14b   : > { %v4576_v3 = vadd.f32 %v4507_v24, %v707_v1  ;;  %v820_v4 = vsel %vm783_vm0, %v4568_v62, 0.0 }
 0x14c   : > { %821 = vadd.xlane.f32.xlu0 %v820_v4  ;;  %v829_v12 = vsel %vm783_vm0, %v4581_v5, 0.0 }
 0x14d   : > { %v823_v6 = vsel %vm783_vm0, %v4576_v3, 0.0 }
 0x14e   : > { %824 = vadd.xlane.f32.xlu1 %v823_v6 }
 0x14f   : > { %v3805_v7 = vpop.f32.mrb[16].mxu0 }
 0x150   : > { %v720_v9 = vpop.f32.mrb[17].mxu0  ;;  %827 = vadd.xlane.f32.xlu0 %v826_v8  ;;  %v4593_v14 = vadd.f32 %v3805_v7, %v4507_v24 }
 0x151   : > { %v4588_v10 = vadd.f32 %v4507_v24, %v720_v9  ;;  %v3806_v11 = vpop.f32.mrb[18].mxu0 }
 0x152   : > { %v723_v13 = vpop.f32.mrb[19].mxu0  ;;  %830 = vadd.xlane.f32.xlu1 %v829_v12  ;;  %v4601_v17 = vadd.f32 %v3806_v11, %v4507_v24  ;;  %v838_v20 = vsel %vm783_vm0, %v4593_v14, 0.0 }
 0x153   : > { %v4596_v15 = vadd.f32 %v4507_v24, %v723_v13  ;;  %v832_v16 = vsel %vm783_vm0, %v4588_v10, 0.0 }
 0x154   : > { %833 = vadd.xlane.f32.xlu0 %v832_v16  ;;  %v841_v25 = vsel %vm783_vm0, %v4601_v17, 0.0 }
 0x155   : > { %v835_v18 = vsel %vm783_vm0, %v4596_v15, 0.0 }
 0x156   : > { %836 = vadd.xlane.f32.xlu1 %v835_v18 }
 0x157   : > { %v3809_v19 = vpop.f32.mrb[20].mxu0 }
 0x158   : > { %v736_v21 = vpop.f32.mrb[21].mxu0  ;;  %839 = vadd.xlane.f32.xlu0 %v838_v20  ;;  %v4613_v29 = vadd.f32 %v3809_v19, %v4507_v24 }
 0x159   : > { %v4608_v22 = vadd.f32 %v4507_v24, %v736_v21  ;;  %v3810_v23 = vpop.f32.mrb[22].mxu0 }
 0x15a   : > { %v739_v27 = vpop.f32.mrb[23].mxu0  ;;  %842 = vadd.xlane.f32.xlu1 %v841_v25  ;;  %v4621_v34 = vadd.f32 %v3810_v23, %v4507_v24  ;;  %v850_v37 = vsel %vm783_vm0, %v4613_v29, 0.0 }
 0x15b   : > { %v4616_v31 = vadd.f32 %v4507_v24, %v739_v27  ;;  %v844_v32 = vsel %vm783_vm0, %v4608_v22, 0.0 }
 0x15c   : > { %845 = vadd.xlane.f32.xlu0 %v844_v32  ;;  %v853_v44 = vsel %vm783_vm0, %v4621_v34, 0.0 }
 0x15d   : > { %v847_v35 = vsel %vm783_vm0, %v4616_v31, 0.0 }
 0x15e   : > { %848 = vadd.xlane.f32.xlu1 %v847_v35 }
 0x15f   : > { %v3813_v36 = vpop.f32.mrb[24].mxu0 }
 0x160   : > { %v752_v38 = vpop.f32.mrb[25].mxu0  ;;  %851 = vadd.xlane.f32.xlu0 %v850_v37  ;;  %v4633_v47 = vadd.f32 %v3813_v36, %v4507_v24 }
 0x161   : > { %v4628_v40 = vadd.f32 %v4507_v24, %v752_v38  ;;  %v3814_v41 = vpop.f32.mrb[26].mxu0 }
 0x162   : > { %v755_v46 = vpop.f32.mrb[27].mxu0  ;;  %854 = vadd.xlane.f32.xlu1 %v853_v44  ;;  %v4641_v51 = vadd.f32 %v3814_v41, %v4507_v24  ;;  %v862_v56 = vsel %vm783_vm0, %v4633_v47, 0.0 }
 0x163   : > { %v4636_v48 = vadd.f32 %v4507_v24, %v755_v46  ;;  %v856_v49 = vsel %vm783_vm0, %v4628_v40, 0.0 }
 0x164   : > { %857 = vadd.xlane.f32.xlu0 %v856_v49  ;;  %v865_v61 = vsel %vm783_vm0, %v4641_v51, 0.0 }
 0x165   : > { %v859_v52 = vsel %vm783_vm0, %v4636_v48, 0.0 }
 0x166   : > { %860 = vadd.xlane.f32.xlu1 %v859_v52 }
 0x167   : > { %v3817_v53 = vpop.f32.mrb[28].mxu0 }
 0x168   : > { %v768_v58 = vpop.f32.mrb[29].mxu0  ;;  %863 = vadd.xlane.f32.xlu0 %v862_v56  ;;  %v4653_v0 = vadd.f32 %v3817_v53, %v4507_v24 }
 0x169   : > { %v4648_v59 = vadd.f32 %v4507_v24, %v768_v58  ;;  %v3818_v60 = vpop.f32.mrb[30].mxu0 }
 0x16a   : > { %v771_v63 = vpop.f32.mrb[31].mxu0  ;;  %866 = vadd.xlane.f32.xlu1 %v865_v61  ;;  %v4661_v6 = vadd.f32 %v3818_v60, %v4507_v24  ;;  %v874_v8 = vsel %vm783_vm0, %v4653_v0, 0.0 }
 0x16b   : > { %v4656_v1 = vadd.f32 %v4507_v24, %v771_v63  ;;  %v868_v4 = vsel %vm783_vm0, %v4648_v59, 0.0 }
 0x16c   : > { %869 = vadd.xlane.f32.xlu0 %v868_v4  ;;  %v877_v9 = vsel %vm783_vm0, %v4661_v6, 0.0 }
 0x16d   : > { %v871_v7 = vsel %vm783_vm0, %v4656_v1, 0.0 }
 0x16e   : > { %872 = vadd.xlane.f32.xlu1 %v871_v7 }
 0x170   : > { %875 = vadd.xlane.f32.xlu0 %v874_v8 }
 0x172   : > { %878 = vadd.xlane.f32.xlu1 %v877_v9 }
 0x1c0   : > { %v792_v11 = vpop.xlane.xlu1 %791 }
 0x1c1   : > { %v883_v12 = vmul.f32 0.03125, %v792_v11  ;;  %v786_v13 = vpop.xlane.xlu0 %785 }
 0x1c2   : > { %v881_v16 = vmul.f32 0.03125, %v786_v13 }
 0x1c3   : > { %v4670_v18 = vsub.f32 %v4510_v26, %v883_v12 }
 0x1c4   : > { %v4673_v24 = vsub.f32 %v4513_v28, %v881_v16  ;;  %v795_v19 = vpop.xlane.xlu1 %794 }
 0x1c5   : > { %v884_v20 = vmul.f32 0.03125, %v795_v19  ;;  %v789_v21 = vpop.xlane.xlu0 %788  ;;  %v947_v26 = vmul.f32 %v4670_v18, %v4670_v18 }
 0x1c6   : > { %v882_v23 = vmul.f32 0.03125, %v789_v21  ;;  %v945_v25 = vmul.f32 %v4673_v24, %v4673_v24 }
 0x1c7   : > { %v4678_v27 = vsub.f32 %v4516_v30, %v884_v20  ;;  %v983_v44 = vsel %vm783_vm0, %v947_v26, 0.0 }
 0x1c8   : > { %v4681_v32 = vsub.f32 %v4521_v33, %v882_v23  ;;  %v977_v35 = vsel %vm783_vm0, %v945_v25, 0.0 }
 0x1c9   : > { %978 = vadd.xlane.f32.xlu0 %v977_v35  ;;  %v798_v28 = vpop.xlane.xlu0 %797  ;;  %v948_v41 = vmul.f32 %v4678_v27, %v4678_v27 }
 0x1ca   : > { %v885_v36 = vmul.f32 0.03125, %v798_v28  ;;  %v946_v37 = vmul.f32 %v4681_v32, %v4681_v32 }
 0x1cb   : > { %v801_v38 = vpop.xlane.xlu1 %800  ;;  %v986_v60 = vsel %vm783_vm0, %v948_v41, 0.0 }
 0x1cc   : > { %v4691_v30 = vsub.f32 %v4530_v39, %v885_v36  ;;  %v886_v33 = vmul.f32 0.03125, %v801_v38  ;;  %v980_v46 = vsel %vm783_vm0, %v946_v37, 0.0 }
 0x1cd   : > { %984 = vadd.xlane.f32.xlu0 %v983_v44  ;;  %981 = vadd.xlane.f32.xlu1 %v980_v46  ;;  %v804_v49 = vpop.xlane.xlu0 %803 }
 0x1ce   : > { %v4696_v52 = vsub.f32 %v4536_v43, %v886_v33  ;;  %v887_v53 = vmul.f32 0.03125, %v804_v49  ;;  %v949_v56 = vmul.f32 %v4691_v30, %v4691_v30 }
 0x1cf   : > { %v807_v58 = vpop.xlane.xlu1 %806 }
 0x1d0   : > { %v4702_v39 = vsub.f32 %v4533_v42, %v887_v53  ;;  %v888_v61 = vmul.f32 0.03125, %v807_v58  ;;  %v989_v63 = vsel %vm783_vm0, %v949_v56, 0.0  ;;  %v950_v4 = vmul.f32 %v4696_v52, %v4696_v52 }
 0x1d1   : > { %987 = vadd.xlane.f32.xlu1 %v986_v60  ;;  %990 = vadd.xlane.f32.xlu0 %v989_v63  ;;  %v810_v43 = vpop.xlane.xlu0 %809 }
 0x1d2   : > { %v4708_v7 = vsub.f32 %v4541_v45, %v888_v61  ;;  %v889_v8 = vmul.f32 0.03125, %v810_v43  ;;  %v951_v9 = vmul.f32 %v4702_v39, %v4702_v39  ;;  %v992_v42 = vsel %vm783_vm0, %v950_v4, 0.0 }
 0x1d3   : > { %v813_v11 = vpop.xlane.xlu1 %812 }
 0x1d4   : > { %v4714_v12 = vsub.f32 %v4548_v50, %v889_v8  ;;  %v890_v13 = vmul.f32 0.03125, %v813_v11  ;;  %v995_v16 = vsel %vm783_vm0, %v951_v9, 0.0  ;;  %v952_v19 = vmul.f32 %v4708_v7, %v4708_v7 }
 0x1d5   : > { %993 = vadd.xlane.f32.xlu1 %v992_v42  ;;  %996 = vadd.xlane.f32.xlu0 %v995_v16  ;;  %v816_v45 = vpop.xlane.xlu0 %815 }
 0x1d6   : > { %v4720_v20 = vsub.f32 %v4556_v55, %v890_v13  ;;  %v891_v21 = vmul.f32 0.03125, %v816_v45  ;;  %v953_v23 = vmul.f32 %v4714_v12, %v4714_v12  ;;  %v998_v50 = vsel %vm783_vm0, %v952_v19, 0.0 }
 0x1d7   : > { %v819_v25 = vpop.xlane.xlu1 %818 }
 0x1d8   : > { %v4726_v35 = vsub.f32 %v4553_v54, %v891_v21  ;;  %v892_v26 = vmul.f32 0.03125, %v819_v25  ;;  %v1001_v28 = vsel %vm783_vm0, %v953_v23, 0.0  ;;  %v954_v36 = vmul.f32 %v4720_v20, %v4720_v20 }
 0x1d9   : > { %999 = vadd.xlane.f32.xlu1 %v998_v50  ;;  %1002 = vadd.xlane.f32.xlu0 %v1001_v28  ;;  %v822_v55 = vpop.xlane.xlu0 %821 }
 0x1da   : > { %v4732_v37 = vsub.f32 %v4561_v57, %v892_v26  ;;  %v893_v38 = vmul.f32 0.03125, %v822_v55  ;;  %v955_v41 = vmul.f32 %v4726_v35, %v4726_v35  ;;  %v1004_v54 = vsel %vm783_vm0, %v954_v36, 0.0 }
 0x1db   : > { %v825_v33 = vpop.xlane.xlu1 %824 }
 0x1dc   : > { %v4738_v44 = vsub.f32 %v4568_v62, %v893_v38  ;;  %v894_v46 = vmul.f32 0.03125, %v825_v33  ;;  %v1007_v49 = vsel %vm783_vm0, %v955_v41, 0.0  ;;  %v956_v53 = vmul.f32 %v4732_v37, %v4732_v37 }
 0x1dd   : > { %1005 = vadd.xlane.f32.xlu1 %v1004_v54  ;;  %1008 = vadd.xlane.f32.xlu0 %v1007_v49  ;;  %v828_v57 = vpop.xlane.xlu0 %827 }
 0x1de   : > { %v4744_v56 = vsub.f32 %v4576_v3, %v894_v46  ;;  %v895_v58 = vmul.f32 0.03125, %v828_v57  ;;  %v957_v60 = vmul.f32 %v4738_v44, %v4738_v44  ;;  %v1010_v62 = vsel %vm783_vm0, %v956_v53, 0.0 }
 0x1df   : > { %v831_v61 = vpop.xlane.xlu1 %830 }
 0x1e0   : > { %v4750_v63 = vsub.f32 %v4573_v2, %v895_v58  ;;  %v896_v4 = vmul.f32 0.03125, %v831_v61  ;;  %v1013_v43 = vsel %vm783_vm0, %v957_v60, 0.0  ;;  %v958_v8 = vmul.f32 %v4744_v56, %v4744_v56  ;;  %v4093_v60 = vld [vmem:[%s5704_s5] sm:$0xff]   ;;  %v4797_v61 = vld [vmem:[%s5706_s7 + $0x10] sm:$0xff]  }
 0x1e1   : > { %1011 = vadd.xlane.f32.xlu1 %v1010_v62  ;;  %1014 = vadd.xlane.f32.xlu0 %v1013_v43  ;;  %v834_v3 = vpop.xlane.xlu0 %833 }
 0x1e2   : > { %v4756_v9 = vsub.f32 %v4581_v5, %v896_v4  ;;  %v897_v11 = vmul.f32 0.03125, %v834_v3  ;;  %v959_v42 = vmul.f32 %v4750_v63, %v4750_v63  ;;  %v1016_v2 = vsel %vm783_vm0, %v958_v8, 0.0  ;;  %3819 = vmatprep.subr.bf16.mxu1 %v4093_v60  ;;  %3891 = vmatprep.subr.bf16.mxu0 %v4797_v61 }
 0x1e3   : > { %v837_v13 = vpop.xlane.xlu1 %836  ;;  %3820 = vmatpush3.bf16.msra.mxu1 %v4093_v60  ;;  %3892 = vmatpush3.bf16.msra.mxu0 %v4797_v61 }
 0x1e4   : > { %v4762_v16 = vsub.f32 %v4588_v10, %v897_v11  ;;  %v898_v19 = vmul.f32 0.03125, %v837_v13  ;;  %v1019_v45 = vsel %vm783_vm0, %v959_v42, 0.0  ;;  %v960_v21 = vmul.f32 %v4756_v9, %v4756_v9 }
 0x1e5   : > { %1017 = vadd.xlane.f32.xlu1 %v1016_v2  ;;  %1020 = vadd.xlane.f32.xlu0 %v1019_v45  ;;  %v840_v5 = vpop.xlane.xlu0 %839  ;;  %v4095_v2 = vld [vmem:[%s5704_s5 + $0x8] sm:$0xff]  }
 0x1e6   : > { %v4768_v23 = vsub.f32 %v4596_v15, %v898_v19  ;;  %v899_v25 = vmul.f32 0.03125, %v840_v5  ;;  %v961_v50 = vmul.f32 %v4762_v16, %v4762_v16  ;;  %v1022_v10 = vsel %vm783_vm0, %v960_v21, 0.0  ;;  %3821 = vmatprep.subr.bf16.mxu1 %v4095_v2 }
 0x1e7   : > { %v843_v26 = vpop.xlane.xlu1 %842  ;;  %3822 = vmatpush3.bf16.msra.mxu1 %v4095_v2 }
 0x1e8   : > { %v4774_v28 = vsub.f32 %v4593_v14, %v899_v25  ;;  %v900_v36 = vmul.f32 0.03125, %v843_v26  ;;  %v1025_v55 = vsel %vm783_vm0, %v961_v50, 0.0  ;;  %v962_v38 = vmul.f32 %v4768_v23, %v4768_v23 }
 0x1e9   : > { %1023 = vadd.xlane.f32.xlu1 %v1022_v10  ;;  %1026 = vadd.xlane.f32.xlu0 %v1025_v55  ;;  %v846_v15 = vpop.xlane.xlu0 %845 }
 0x1ea   : > { %v4780_v41 = vsub.f32 %v4601_v17, %v900_v36  ;;  %v901_v33 = vmul.f32 0.03125, %v846_v15  ;;  %v963_v54 = vmul.f32 %v4774_v28, %v4774_v28  ;;  %v1028_v14 = vsel %vm783_vm0, %v962_v38, 0.0 }
 0x1eb   : > { %v849_v46 = vpop.xlane.xlu1 %848 }
 0x1ec   : > { %v4786_v49 = vsub.f32 %v4608_v22, %v901_v33  ;;  %v902_v53 = vmul.f32 0.03125, %v849_v46  ;;  %v1031_v57 = vsel %vm783_vm0, %v963_v54, 0.0  ;;  %v964_v58 = vmul.f32 %v4780_v41, %v4780_v41 }
 0x1ed   : > { %1029 = vadd.xlane.f32.xlu1 %v1028_v14  ;;  %1032 = vadd.xlane.f32.xlu0 %v1031_v57  ;;  %v852_v17 = vpop.xlane.xlu0 %851 }
 0x1ee   : > { %v4800_v22 = vsub.f32 %v4616_v31, %v902_v53  ;;  %v903_v62 = vmul.f32 0.03125, %v852_v17  ;;  %v965_v4 = vmul.f32 %v4786_v49, %v4786_v49  ;;  %v1034_v8 = vsel %vm783_vm0, %v964_v58, 0.0 }
 0x1ef   : > { %v855_v43 = vpop.xlane.xlu1 %854 }
 0x1f0   : > { %v4807_v3 = vsub.f32 %v4613_v29, %v903_v62  ;;  %v904_v11 = vmul.f32 0.03125, %v855_v43  ;;  %v1037_v42 = vsel %vm783_vm0, %v965_v4, 0.0  ;;  %v966_v31 = vmul.f32 %v4800_v22, %v4800_v22  ;;  %v4819_v29 = vld [vmem:[%s5706_s7 + $0x18] sm:$0xff]  }
 0x1f1   : > { %1035 = vadd.xlane.f32.xlu1 %v1034_v8  ;;  %1038 = vadd.xlane.f32.xlu0 %v1037_v42  ;;  %v858_v13 = vpop.xlane.xlu0 %857 }
 0x1f2   : > { %v4822_v19 = vsub.f32 %v4621_v34, %v904_v11  ;;  %v905_v45 = vmul.f32 0.03125, %v858_v13  ;;  %v967_v21 = vmul.f32 %v4807_v3, %v4807_v3  ;;  %v1040_v25 = vsel %vm783_vm0, %v966_v31, 0.0  ;;  %3893 = vmatprep.subr.bf16.mxu0 %v4819_v29 }
 0x1f3   : > { %v861_v5 = vpop.xlane.xlu1 %860  ;;  %3894 = vmatpush3.bf16.msra.mxu0 %v4819_v29 }
 0x1f4   : > { %v4829_v50 = vsub.f32 %v4628_v40, %v905_v45  ;;  %v906_v26 = vmul.f32 0.03125, %v861_v5  ;;  %v1043_v10 = vsel %vm783_vm0, %v967_v21, 0.0  ;;  %v968_v34 = vmul.f32 %v4822_v19, %v4822_v19 }
 0x1f5   : > { %1041 = vadd.xlane.f32.xlu1 %v1040_v25  ;;  %1044 = vadd.xlane.f32.xlu0 %v1043_v10  ;;  %v864_v36 = vpop.xlane.xlu0 %863 }
 0x1f6   : > { %v4836_v55 = vsub.f32 %v4636_v48, %v906_v26  ;;  %v907_v38 = vmul.f32 0.03125, %v864_v36  ;;  %v969_v40 = vmul.f32 %v4829_v50, %v4829_v50  ;;  %v1046_v33 = vsel %vm783_vm0, %v968_v34, 0.0  ;;  %v4883_v34 = vld [vmem:[%s5706_s7] sm:$0xff]   ;;  %v4890_v36 = vld [vmem:[%s5706_s7 + $0x30] sm:$0xff]  }
 0x1f7   : > { %v867_v15 = vpop.xlane.xlu1 %866  ;;  %3855 = vmatprep.subr.bf16.mxu1 %v4883_v34  ;;  %3963 = vmatprep.subr.bf16.mxu0 %v4890_v36 }
 0x1f8   : > { %v4842_v54 = vsub.f32 %v4633_v47, %v907_v38  ;;  %v908_v46 = vmul.f32 0.03125, %v867_v15  ;;  %v1049_v14 = vsel %vm783_vm0, %v969_v40, 0.0  ;;  %v970_v53 = vmul.f32 %v4836_v55, %v4836_v55 }
 0x1f9   : > { %1047 = vadd.xlane.f32.xlu1 %v1046_v33  ;;  %1050 = vadd.xlane.f32.xlu0 %v1049_v14  ;;  %v870_v48 = vpop.xlane.xlu0 %869 }
 0x1fa   : > { %v4848_v57 = vsub.f32 %v4641_v51, %v908_v46  ;;  %v909_v58 = vmul.f32 0.03125, %v870_v48  ;;  %v971_v17 = vmul.f32 %v4842_v54, %v4842_v54  ;;  %v1052_v47 = vsel %vm783_vm0, %v970_v53, 0.0 }
 0x1fb   : > { %v873_v60 = vpop.xlane.xlu1 %872 }
 0x1fc   : > { %v4854_v62 = vsub.f32 %v4648_v59, %v909_v58  ;;  %v910_v4 = vmul.f32 0.03125, %v873_v60  ;;  %v1055_v43 = vsel %vm783_vm0, %v971_v17, 0.0  ;;  %v972_v8 = vmul.f32 %v4848_v57, %v4848_v57 }
 0x1fd   : > { %1053 = vadd.xlane.f32.xlu1 %v1052_v47  ;;  %1056 = vadd.xlane.f32.xlu0 %v1055_v43  ;;  %v876_v51 = vpop.xlane.xlu0 %875 }
 0x1fe   : > { %v4860_v11 = vsub.f32 %v4656_v1, %v910_v4  ;;  %v911_v42 = vmul.f32 0.03125, %v876_v51  ;;  %v973_v31 = vmul.f32 %v4854_v62, %v4854_v62  ;;  %v1058_v59 = vsel %vm783_vm0, %v972_v8, 0.0 }
 0x1ff   : > { %v879_v13 = vpop.xlane.xlu1 %878 }
 0x200   : > { %v4866_v2 = vsub.f32 %v4653_v0, %v911_v42  ;;  %v912_v45 = vmul.f32 0.03125, %v879_v13  ;;  %v1061_v21 = vsel %vm783_vm0, %v973_v31, 0.0  ;;  %v974_v5 = vmul.f32 %v4860_v11, %v4860_v11 }
 0x201   : > { %1059 = vadd.xlane.f32.xlu1 %v1058_v59  ;;  %1062 = vadd.xlane.f32.xlu0 %v1061_v21 }
 0x202   : > { %v4872_v1 = vsub.f32 %v4661_v6, %v912_v45  ;;  %v975_v25 = vmul.f32 %v4866_v2, %v4866_v2  ;;  %v1064_v26 = vsel %vm783_vm0, %v974_v5, 0.0 }
 0x204   : > { %v1067_v10 = vsel %vm783_vm0, %v975_v25, 0.0  ;;  %v976_v0 = vmul.f32 %v4872_v1, %v4872_v1 }
 0x205   : > { %1065 = vadd.xlane.f32.xlu1 %v1064_v26  ;;  %1068 = vadd.xlane.f32.xlu0 %v1067_v10  ;;  %v4897_v10 = vld [vmem:[%s5702_s3] ss:$0 sm:$0xff] }
 0x206   : > { %v1070_v6 = vsel %vm783_vm0, %v976_v0, 0.0 }
 0x209   : > { %1071 = vadd.xlane.f32.xlu1 %v1070_v6 }
 0x256   : > { %v979_v38 = vpop.xlane.xlu0 %978 }
 0x257   : > { %v1073_v40 = vmul.f32 0.03125, %v979_v38 }
 0x259   : > { %v1105_v15 = vadd.f32 1e-05, %v1073_v40 }
 0x25a   : > { %v982_v33 = vpop.xlane.xlu1 %981  ;;  %v985_v46 = vpop.xlane.xlu0 %984 }
 0x25b   : > { %4103 = vrsqrt.f32 %v1105_v15  ;;  %v1074_v14 = vmul.f32 0.03125, %v982_v33  ;;  %v1075_v53 = vmul.f32 0.03125, %v985_v46 }
 0x25d   : > { %v1106_v48 = vadd.f32 1e-05, %v1074_v14  ;;  %v1107_v58 = vadd.f32 1e-05, %v1075_v53 }
 0x25e   : > { %v988_v17 = vpop.xlane.xlu1 %987  ;;  %v991_v60 = vpop.xlane.xlu0 %990 }
 0x25f   : > { %4105 = vrsqrt.f32 %v1106_v48  ;;  %v1076_v47 = vmul.f32 0.03125, %v988_v17  ;;  %v1077_v4 = vmul.f32 0.03125, %v991_v60  ;;  %v4905_v60 = vld [vmem:[%s5703_s4] ss:$0 sm:$0xff] }
 0x260   : > { %4107 = vrsqrt.f32 %v1107_v58 }
 0x261   : > { %v1108_v43 = vadd.f32 1e-05, %v1076_v47  ;;  %v1109_v8 = vadd.f32 1e-05, %v1077_v4 }
 0x262   : > { %v994_v51 = vpop.xlane.xlu1 %993  ;;  %v997_v42 = vpop.xlane.xlu0 %996 }
 0x263   : > { %4109 = vrsqrt.f32 %v1108_v43  ;;  %v1078_v31 = vmul.f32 0.03125, %v994_v51  ;;  %v1079_v13 = vmul.f32 0.03125, %v997_v42 }
 0x264   : > { %4111 = vrsqrt.f32 %v1109_v8 }
 0x265   : > { %v4104_v59 = vpop.eup %4103  ;;  %v1110_v45 = vadd.f32 1e-05, %v1078_v31  ;;  %v1111_v21 = vadd.f32 1e-05, %v1079_v13 }
 0x266   : > { %v1169_v5 = vmul.f32 %v4104_v59, %v4673_v24  ;;  %v1000_v25 = vpop.xlane.xlu1 %999  ;;  %v1003_v26 = vpop.xlane.xlu0 %1002 }
 0x267   : > { %4113 = vrsqrt.f32 %v1110_v45  ;;  %v1080_v0 = vmul.f32 0.03125, %v1000_v25  ;;  %v1081_v6 = vmul.f32 0.03125, %v1003_v26 }
 0x268   : > { %4115 = vrsqrt.f32 %v1111_v21  ;;  %v1208_v46 = vmul.f32 %v4897_v10, %v1169_v5 }
 0x269   : > { %v4106_v38 = vpop.eup %4105  ;;  %v1112_v40 = vadd.f32 1e-05, %v1080_v0  ;;  %v1113_v15 = vadd.f32 1e-05, %v1081_v6 }
 0x26a   : > { %v4108_v33 = vpop.eup %4107  ;;  %v1170_v14 = vmul.f32 %v4106_v38, %v4681_v32  ;;  %v1006_v24 = vpop.xlane.xlu1 %1005  ;;  %v1247_v13 = vadd.f32 %v4905_v60, %v1208_v46 }
 0x26b   : > { %v1009_v53 = vpop.xlane.xlu0 %1008  ;;  %v1171_v48 = vmul.f32 %v4108_v33, %v4670_v18  ;;  %4117 = vrsqrt.f32 %v1112_v40  ;;  %v1082_v58 = vmul.f32 0.03125, %v1006_v24 }
 0x26c   : > { %v1083_v17 = vmul.f32 0.03125, %v1009_v53  ;;  %v1209_v47 = vmul.f32 %v4897_v10, %v1170_v14  ;;  %4119 = vrsqrt.f32 %v1113_v15 }
 0x26d   : > { %v4110_v4 = vpop.eup %4109  ;;  %v1114_v43 = vadd.f32 1e-05, %v1082_v58  ;;  %v1210_v32 = vmul.f32 %v4897_v10, %v1171_v48 }
 0x26e   : > { %v1115_v8 = vadd.f32 1e-05, %v1083_v17  ;;  %v4112_v51 = vpop.eup %4111  ;;  %v1172_v42 = vmul.f32 %v4110_v4, %v4678_v27  ;;  %v1012_v18 = vpop.xlane.xlu1 %1011  ;;  %v1248_v59 = vadd.f32 %v4905_v60, %v1209_v47  ;;  %v4098_v17 = vld [vmem:[%s5706_s7 + $0x8] sm:$0xff]   ;;  %v4100_v47 = vld [vmem:[%s5706_s7 + $0x38] sm:$0xff]  }
 0x26f   : > { %v1015_v31 = vpop.xlane.xlu0 %1014  ;;  %v1173_v45 = vmul.f32 %v4112_v51, %v4691_v30  ;;  %4121 = vrsqrt.f32 %v1114_v43  ;;  %v1084_v21 = vmul.f32 0.03125, %v1012_v18  ;;  %v1249_v46 = vadd.f32 %v4905_v60, %v1210_v32 }
 0x270   : > { %v1085_v5 = vmul.f32 0.03125, %v1015_v31  ;;  %v1211_v25 = vmul.f32 %v4897_v10, %v1172_v42  ;;  %4123 = vrsqrt.f32 %v1115_v8  ;;  %v4914_v26 = vpack.c.bf16 %v1248_v59, %v1247_v13 }
 0x271   : > { %v4114_v0 = vpop.eup %4113  ;;  %v1212_v6 = vmul.f32 %v4897_v10, %v1173_v45  ;;  %v1116_v27 = vadd.f32 1e-05, %v1084_v21 }
 0x272   : > { %v1117_v38 = vadd.f32 1e-05, %v1085_v5  ;;  %v4116_v40 = vpop.eup %4115  ;;  %v1174_v15 = vmul.f32 %v4114_v0, %v4696_v52  ;;  %v1018_v33 = vpop.xlane.xlu1 %1017  ;;  %3823 = vmatprep.mubr.msk.bf16.mxu1 %vm783_vm0, %v4914_v26  ;;  %3895 = vmatprep.mubr.msk.bf16.mxu0 %vm783_vm0, %v4914_v26  ;;  %v1250_v14 = vadd.f32 %v4905_v60, %v1211_v25 }
 0x273   : > { %v1021_v30 = vpop.xlane.xlu0 %1020  ;;  %v1175_v24 = vmul.f32 %v4116_v40, %v4702_v39  ;;  %4125 = vrsqrt.f32 %v1116_v27  ;;  %v1086_v53 = vmul.f32 0.03125, %v1018_v33  ;;  %v1251_v39 = vadd.f32 %v4905_v60, %v1212_v6 }
 0x274   : > { %v1087_v48 = vmul.f32 0.03125, %v1021_v30  ;;  %v1213_v58 = vmul.f32 %v4897_v10, %v1174_v15  ;;  %4127 = vrsqrt.f32 %v1117_v38  ;;  %v4926_v52 = vpack.c.bf16 %v1250_v14, %v1249_v46 }
 0x275   : > { %v4118_v4 = vpop.eup %4117  ;;  %v1118_v43 = vadd.f32 1e-05, %v1086_v53  ;;  %v1214_v32 = vmul.f32 %v4897_v10, %v1175_v24 }
 0x276   : > { %v1119_v8 = vadd.f32 1e-05, %v1087_v48  ;;  %v4120_v51 = vpop.eup %4119  ;;  %v1176_v42 = vmul.f32 %v4118_v4, %v4708_v7  ;;  %v1024_v18 = vpop.xlane.xlu1 %1023  ;;  %3824 = vmatmul.mubr.msk.bf16.vlgmr.msra.gmra.mrb[0].mxu1 %vm783_vm0, %v4926_v52  ;;  %3896 = vmatmul.mubr.msk.bf16.vlgmr.msra.gmra.mrb[32].mxu0 %vm783_vm0, %v4926_v52  ;;  %v1252_v13 = vadd.f32 %v4905_v60, %v1213_v58 }
 0x277   : > { %v1027_v31 = vpop.xlane.xlu0 %1026  ;;  %v1177_v59 = vmul.f32 %v4120_v51, %v4714_v12  ;;  %4129 = vrsqrt.f32 %v1118_v43  ;;  %v1088_v45 = vmul.f32 0.03125, %v1024_v18  ;;  %3856 = vmatpush3.bf16.msra.mxu1 %v4883_v34  ;;  %3964 = vmatpush3.bf16.msra.mxu0 %v4890_v36  ;;  %v1253_v36 = vadd.f32 %v4905_v60, %v1214_v32 }
 0x278   : > { %v1089_v21 = vmul.f32 0.03125, %v1027_v31  ;;  %v1215_v7 = vmul.f32 %v4897_v10, %v1176_v42  ;;  %4131 = vrsqrt.f32 %v1119_v8  ;;  %v4946_v5 = vpack.c.bf16 %v1252_v13, %v1251_v39  ;;  %3857 = vmatprep.subr.bf16.mxu1 %v4098_v17  ;;  %3965 = vmatprep.subr.bf16.mxu0 %v4100_v47 }
 0x279   : > { %v4122_v25 = vpop.eup %4121  ;;  %v1216_v0 = vmul.f32 %v4897_v10, %v1177_v59  ;;  %v1120_v6 = vadd.f32 1e-05, %v1088_v45 }
 0x27a   : > { %v1121_v27 = vadd.f32 1e-05, %v1089_v21  ;;  %v4124_v12 = vpop.eup %4123  ;;  %v1178_v38 = vmul.f32 %v4122_v25, %v4720_v20  ;;  %v1030_v40 = vpop.xlane.xlu1 %1029  ;;  %3827 = vmatprep.mubr.msk.bf16.mxu1 %vm783_vm0, %v4946_v5  ;;  %3899 = vmatprep.mubr.msk.bf16.mxu0 %vm783_vm0, %v4946_v5  ;;  %v1254_v15 = vadd.f32 %v4905_v60, %v1215_v7 }
 0x27b   : > { %v1033_v34 = vpop.xlane.xlu0 %1032  ;;  %v1179_v33 = vmul.f32 %v4124_v12, %v4726_v35  ;;  %4133 = vrsqrt.f32 %v1120_v6  ;;  %v1090_v30 = vmul.f32 0.03125, %v1030_v40  ;;  %3858 = vmatpush3.bf16.msra.mxu1 %v4098_v17  ;;  %3966 = vmatpush3.bf16.msra.mxu0 %v4100_v47  ;;  %v1255_v58 = vadd.f32 %v4905_v60, %v1216_v0 }
 0x27c   : > { %v1091_v46 = vmul.f32 0.03125, %v1033_v34  ;;  %v1217_v20 = vmul.f32 %v4897_v10, %v1178_v38  ;;  %4135 = vrsqrt.f32 %v1121_v27  ;;  %v4958_v14 = vpack.c.bf16 %v1254_v15, %v1253_v36  ;;  %3999 = vmatprep.subr.bf16.mxu1 %v4797_v61 }
 0x27d   : > { %v4126_v24 = vpop.eup %4125  ;;  %v1122_v53 = vadd.f32 1e-05, %v1090_v30  ;;  %v1218_v35 = vmul.f32 %v4897_v10, %v1179_v33 }
 0x27e   : > { %v1123_v48 = vadd.f32 1e-05, %v1091_v46  ;;  %v4128_v4 = vpop.eup %4127  ;;  %v1180_v43 = vmul.f32 %v4126_v24, %v4732_v37  ;;  %v1036_v8 = vpop.xlane.xlu1 %1035  ;;  %3828 = vmatmul.mubr.msk.bf16.gmra.mrb[4].mxu1 %vm783_vm0, %v4958_v14  ;;  %3900 = vmatmul.mubr.msk.bf16.gmra.mrb[36].mxu0 %vm783_vm0, %v4958_v14  ;;  %v1256_v47 = vadd.f32 %v4905_v60, %v1217_v20 }
 0x27f   : > { %v1039_v17 = vpop.xlane.xlu0 %1038  ;;  %v1181_v39 = vmul.f32 %v4128_v4, %v4738_v44  ;;  %4137 = vrsqrt.f32 %v1122_v53  ;;  %v1092_v51 = vmul.f32 0.03125, %v1036_v8  ;;  %v1257_v25 = vadd.f32 %v4905_v60, %v1218_v35 }
 0x280   : > { %v1093_v32 = vmul.f32 0.03125, %v1039_v17  ;;  %v1219_v42 = vmul.f32 %v4897_v10, %v1180_v43  ;;  %4139 = vrsqrt.f32 %v1123_v48  ;;  %v4971_v18 = vpack.c.bf16 %v1256_v47, %v1255_v58 }
 0x281   : > { %v4130_v37 = vpop.eup %4129  ;;  %v1220_v31 = vmul.f32 %v4897_v10, %v1181_v39  ;;  %v1124_v13 = vadd.f32 1e-05, %v1092_v51 }
 0x282   : > { %v1125_v59 = vadd.f32 1e-05, %v1093_v32  ;;  %v4132_v45 = vpop.eup %4131  ;;  %v1182_v21 = vmul.f32 %v4130_v37, %v4744_v56  ;;  %v1042_v7 = vpop.xlane.xlu1 %1041  ;;  %3831 = vmatprep.mubr.msk.bf16.mxu1 %vm783_vm0, %v4971_v18  ;;  %3903 = vmatprep.mubr.msk.bf16.mxu0 %vm783_vm0, %v4971_v18  ;;  %v1258_v0 = vadd.f32 %v4905_v60, %v1219_v42 }
 0x283   : > { %v1045_v44 = vpop.xlane.xlu0 %1044  ;;  %v1183_v6 = vmul.f32 %v4132_v45, %v4750_v63  ;;  %4141 = vrsqrt.f32 %v1124_v13  ;;  %v1094_v27 = vmul.f32 0.03125, %v1042_v7  ;;  %v1259_v15 = vadd.f32 %v4905_v60, %v1220_v31 }
 0x284   : > { %v1095_v12 = vmul.f32 0.03125, %v1045_v44  ;;  %v1221_v38 = vmul.f32 %v4897_v10, %v1182_v21  ;;  %4143 = vrsqrt.f32 %v1125_v59  ;;  %v4983_v56 = vpack.c.bf16 %v1258_v0, %v1257_v25 }
 0x285   : > { %v4134_v40 = vpop.eup %4133  ;;  %v1126_v34 = vadd.f32 1e-05, %v1094_v27  ;;  %v1222_v30 = vmul.f32 %v4897_v10, %v1183_v6 }
 0x286   : > { %v1127_v36 = vadd.f32 1e-05, %v1095_v12  ;;  %v4136_v33 = vpop.eup %4135  ;;  %v1184_v46 = vmul.f32 %v4134_v40, %v4756_v9  ;;  %v1048_v20 = vpop.xlane.xlu1 %1047  ;;  %3832 = vmatmul.mubr.msk.bf16.gmra.mrb[8].mxu1 %vm783_vm0, %v4983_v56  ;;  %3904 = vmatmul.mubr.msk.bf16.gmra.mrb[40].mxu0 %vm783_vm0, %v4983_v56  ;;  %v1260_v24 = vadd.f32 %v4905_v60, %v1221_v38 }
 0x287   : > { %v1051_v63 = vpop.xlane.xlu0 %1050  ;;  %v1185_v53 = vmul.f32 %v4136_v33, %v4762_v16  ;;  %4145 = vrsqrt.f32 %v1126_v34  ;;  %v1096_v48 = vmul.f32 0.03125, %v1048_v20  ;;  %v1261_v32 = vadd.f32 %v4905_v60, %v1222_v30 }
 0x288   : > { %v1097_v58 = vmul.f32 0.03125, %v1051_v63  ;;  %v1223_v4 = vmul.f32 %v4897_v10, %v1184_v46  ;;  %4147 = vrsqrt.f32 %v1127_v36  ;;  %v4995_v35 = vpack.c.bf16 %v1260_v24, %v1259_v15 }
 0x289   : > { %v4138_v9 = vpop.eup %4137  ;;  %v1224_v43 = vmul.f32 %v4897_v10, %v1185_v53  ;;  %v1128_v8 = vadd.f32 1e-05, %v1096_v48 }
 0x28a   : > { %v1129_v17 = vadd.f32 1e-05, %v1097_v58  ;;  %v4140_v47 = vpop.eup %4139  ;;  %v1186_v39 = vmul.f32 %v4138_v9, %v4768_v23  ;;  %v1054_v51 = vpop.xlane.xlu1 %1053  ;;  %3835 = vmatprep.mubr.msk.bf16.mxu1 %vm783_vm0, %v4995_v35  ;;  %3907 = vmatprep.mubr.msk.bf16.mxu0 %vm783_vm0, %v4995_v35  ;;  %v1262_v42 = vadd.f32 %v4905_v60, %v1223_v4 }
 0x28b   : > { %v1057_v16 = vpop.xlane.xlu0 %1056  ;;  %v1187_v37 = vmul.f32 %v4140_v47, %v4774_v28  ;;  %4149 = vrsqrt.f32 %v1128_v8  ;;  %v1098_v31 = vmul.f32 0.03125, %v1054_v51  ;;  %v1263_v44 = vadd.f32 %v4905_v60, %v1224_v43 }
 0x28c   : > { %v1099_v13 = vmul.f32 0.03125, %v1057_v16  ;;  %v1225_v59 = vmul.f32 %v4897_v10, %v1186_v39  ;;  %4151 = vrsqrt.f32 %v1129_v17  ;;  %v5007_v23 = vpack.c.bf16 %v1262_v42, %v1261_v32 }
 0x28d   : > { %v4142_v45 = vpop.eup %4141  ;;  %v1130_v21 = vadd.f32 1e-05, %v1098_v31  ;;  %v1226_v0 = vmul.f32 %v4897_v10, %v1187_v37 }
 0x28e   : > { %v1131_v7 = vadd.f32 1e-05, %v1099_v13  ;;  %v4144_v25 = vpop.eup %4143  ;;  %v1188_v6 = vmul.f32 %v4142_v45, %v4780_v41  ;;  %v1060_v27 = vpop.xlane.xlu1 %1059  ;;  %3836 = vmatmul.mubr.msk.bf16.gmra.mrb[12].mxu1 %vm783_vm0, %v5007_v23  ;;  %3908 = vmatmul.mubr.msk.bf16.gmra.mrb[44].mxu0 %vm783_vm0, %v5007_v23  ;;  %v1264_v12 = vadd.f32 %v4905_v60, %v1225_v59 }
 0x28f   : > { %v1063_v28 = vpop.xlane.xlu0 %1062  ;;  %v1189_v38 = vmul.f32 %v4144_v25, %v4786_v49  ;;  %4153 = vrsqrt.f32 %v1130_v21  ;;  %v1100_v40 = vmul.f32 0.03125, %v1060_v27  ;;  %v1265_v53 = vadd.f32 %v4905_v60, %v1226_v0 }
 0x290   : > { %v1101_v34 = vmul.f32 0.03125, %v1063_v28  ;;  %v1227_v36 = vmul.f32 %v4897_v10, %v1188_v6  ;;  %4155 = vrsqrt.f32 %v1131_v7  ;;  %v5019_v15 = vpack.c.bf16 %v1264_v12, %v1263_v44 }
 0x291   : > { %v4146_v41 = vpop.eup %4145  ;;  %v1228_v33 = vmul.f32 %v4897_v10, %v1189_v38  ;;  %v1132_v30 = vadd.f32 1e-05, %v1100_v40 }
 0x292   : > { %v1133_v46 = vadd.f32 1e-05, %v1101_v34  ;;  %v4148_v20 = vpop.eup %4147  ;;  %v1190_v63 = vmul.f32 %v4146_v41, %v4800_v22  ;;  %v1066_v24 = vpop.xlane.xlu1 %1065  ;;  %3839 = vmatprep.mubr.msk.bf16.mxu1 %vm783_vm0, %v5019_v15  ;;  %3911 = vmatprep.mubr.msk.bf16.mxu0 %vm783_vm0, %v5019_v15  ;;  %v1266_v48 = vadd.f32 %v4905_v60, %v1227_v36 }
 0x293   : > { %v1069_v49 = vpop.xlane.xlu0 %1068  ;;  %v1191_v58 = vmul.f32 %v4148_v20, %v4807_v3  ;;  %4157 = vrsqrt.f32 %v1132_v30  ;;  %v1102_v4 = vmul.f32 0.03125, %v1066_v24  ;;  %v1267_v39 = vadd.f32 %v4905_v60, %v1228_v33 }
 0x294   : > { %v1103_v9 = vmul.f32 0.03125, %v1069_v49  ;;  %v1229_v43 = vmul.f32 %v4897_v10, %v1190_v63  ;;  %4159 = vrsqrt.f32 %v1133_v46  ;;  %v5031_v22 = vpack.c.bf16 %v1266_v48, %v1265_v53 }
 0x295   : > { %v4150_v8 = vpop.eup %4149  ;;  %v1134_v17 = vadd.f32 1e-05, %v1102_v4  ;;  %v1230_v16 = vmul.f32 %v4897_v10, %v1191_v58 }
 0x296   : > { %v1135_v47 = vadd.f32 1e-05, %v1103_v9  ;;  %v4152_v51 = vpop.eup %4151  ;;  %v1192_v32 = vmul.f32 %v4150_v8, %v4822_v19  ;;  %v1072_v42 = vpop.xlane.xlu1 %1071  ;;  %3840 = vmatmul.mubr.msk.bf16.gmra.mrb[16].mxu1 %vm783_vm0, %v5031_v22  ;;  %3912 = vmatmul.mubr.msk.bf16.gmra.mrb[48].mxu0 %vm783_vm0, %v5031_v22  ;;  %v1268_v3 = vadd.f32 %v4905_v60, %v1229_v43 }
 0x297   : > { %v1193_v37 = vmul.f32 %v4152_v51, %v4829_v50  ;;  %4161 = vrsqrt.f32 %v1134_v17  ;;  %v1104_v31 = vmul.f32 0.03125, %v1072_v42  ;;  %v1269_v50 = vadd.f32 %v4905_v60, %v1230_v16 }
 0x298   : > { %v1231_v13 = vmul.f32 %v4897_v10, %v1192_v32  ;;  %4163 = vrsqrt.f32 %v1135_v47  ;;  %v5043_v59 = vpack.c.bf16 %v1268_v3, %v1267_v39 }
 0x299   : > { %v4154_v45 = vpop.eup %4153  ;;  %v1232_v19 = vmul.f32 %v4897_v10, %v1193_v37  ;;  %v1136_v21 = vadd.f32 1e-05, %v1104_v31 }
 0x29a   : > { %v4156_v7 = vpop.eup %4155  ;;  %v1194_v44 = vmul.f32 %v4154_v45, %v4836_v55  ;;  %3843 = vmatprep.mubr.msk.bf16.mxu1 %vm783_vm0, %v5043_v59  ;;  %3915 = vmatprep.mubr.msk.bf16.mxu0 %vm783_vm0, %v5043_v59  ;;  %v1270_v25 = vadd.f32 %v4905_v60, %v1231_v13 }
 0x29b   : > { %v1195_v0 = vmul.f32 %v4156_v7, %v4842_v54  ;;  %4165 = vrsqrt.f32 %v1136_v21  ;;  %v1271_v55 = vadd.f32 %v4905_v60, %v1232_v19 }
 0x29c   : > { %v1233_v6 = vmul.f32 %v4897_v10, %v1194_v44  ;;  %v5055_v27 = vpack.c.bf16 %v1270_v25, %v1269_v50 }
 0x29d   : > { %v4158_v28 = vpop.eup %4157  ;;  %v1234_v38 = vmul.f32 %v4897_v10, %v1195_v0 }
 0x29e   : > { %v4160_v12 = vpop.eup %4159  ;;  %v1196_v40 = vmul.f32 %v4158_v28, %v4848_v57  ;;  %3844 = vmatmul.mubr.msk.bf16.gmra.mrb[20].mxu1 %vm783_vm0, %v5055_v27  ;;  %3916 = vmatmul.mubr.msk.bf16.gmra.mrb[52].mxu0 %vm783_vm0, %v5055_v27  ;;  %v1272_v54 = vadd.f32 %v4905_v60, %v1233_v6 }
 0x29f   : > { %v1197_v34 = vmul.f32 %v4160_v12, %v4854_v62  ;;  %v1273_v20 = vadd.f32 %v4905_v60, %v1234_v38 }
 0x2a0   : > { %v1235_v36 = vmul.f32 %v4897_v10, %v1196_v40  ;;  %v5067_v41 = vpack.c.bf16 %v1272_v54, %v1271_v55 }
 0x2a1   : > { %v4162_v33 = vpop.eup %4161  ;;  %v1236_v30 = vmul.f32 %v4897_v10, %v1197_v34 }
 0x2a2   : > { %v4164_v46 = vpop.eup %4163  ;;  %v1198_v57 = vmul.f32 %v4162_v33, %v4860_v11  ;;  %3847 = vmatprep.mubr.msk.bf16.mxu1 %vm783_vm0, %v5067_v41  ;;  %3919 = vmatprep.mubr.msk.bf16.mxu0 %vm783_vm0, %v5067_v41  ;;  %v1274_v62 = vadd.f32 %v4905_v60, %v1235_v36 }
 0x2a3   : > { %v1199_v63 = vmul.f32 %v4164_v46, %v4866_v2  ;;  %v1275_v48 = vadd.f32 %v4905_v60, %v1236_v30 }
 0x2a4   : > { %v1237_v24 = vmul.f32 %v4897_v10, %v1198_v57  ;;  %v5079_v49 = vpack.c.bf16 %v1274_v62, %v1273_v20 }
 0x2a5   : > { %v4166_v53 = vpop.eup %4165  ;;  %v1238_v11 = vmul.f32 %v4897_v10, %v1199_v63 }
 0x2a6   : > { %v1200_v58 = vmul.f32 %v4166_v53, %v4872_v1  ;;  %3848 = vmatmul.mubr.msk.bf16.gmra.mrb[24].mxu1 %vm783_vm0, %v5079_v49  ;;  %3920 = vmatmul.mubr.msk.bf16.gmra.mrb[56].mxu0 %vm783_vm0, %v5079_v49  ;;  %v1276_v4 = vadd.f32 %v4905_v60, %v1237_v24 }
 0x2a7   : > { %3967 = vmatprep.mubr.msk.bf16.mxu0 %vm783_vm0, %v4914_v26  ;;  %v1277_v43 = vadd.f32 %v4905_v60, %v1238_v11 }
 0x2a8   : > { %v1239_v2 = vmul.f32 %v4897_v10, %v1200_v58  ;;  %v1293_v9 = vpack.c.bf16 %v1276_v4, %v1275_v48  ;;  %v4101_v10 = vld [vmem:[%s5706_s7 + $0x20] sm:$0xff]  }
 0x2aa   : > { %3851 = vmatprep.mubr.msk.bf16.mxu1 %vm783_vm0, %v1293_v9  ;;  %v1278_v1 = vadd.f32 %v4905_v60, %v1239_v2 }
 0x2ac   : > { %v1294_v8 = vpack.c.bf16 %v1278_v1, %v1277_v43 }
 0x2ae   : > { %3852 = vmatmul.mubr.msk.bf16.gmra.mrb[28].mxu1 %vm783_vm0, %v1294_v8  ;;  %3968 = vmatmul.mubr.msk.bf16.vlgmr.msra.gmra.mrb[60].mxu0 %vm783_vm0, %v4926_v52 }
 0x2af   : > { %3859 = vmatprep.mubr.msk.bf16.mxu1 %vm783_vm0, %v4914_v26  ;;  %3971 = vmatprep.mubr.msk.bf16.mxu0 %vm783_vm0, %v4946_v5 }
 0x2b6   : > { %3860 = vmatmul.mubr.msk.bf16.vlgmr.msra.gmra.mrb[32].mxu1 %vm783_vm0, %v4926_v52  ;;  %3972 = vmatmul.mubr.msk.bf16.gmra.mrb[64].mxu0 %vm783_vm0, %v4958_v14 }
 0x2b7   : > { %4001 = vmatpush3.bf16.msra.mxu1 %v4797_v61  ;;  %3863 = vmatprep.mubr.msk.bf16.mxu1 %vm783_vm0, %v4946_v5  ;;  %v4102_v61 = vld [vmem:[%s5706_s7 + $0x28] sm:$0xff]  }
 0x2b8   : > { %3975 = vmatprep.mubr.msk.bf16.mxu0 %vm783_vm0, %v4971_v18  ;;  %4000 = vmatprep.subr.bf16.mxu1 %v4819_v29 }
 0x2bb   : > { %4002 = vmatpush3.bf16.msra.mxu1 %v4819_v29  ;;  %v5200_v29 = vld [vmem:[%s5707_s8 + $0x1] ss:$0 sm:$0xff] }
 0x2bc   : > { %3927 = vmatprep.subr.bf16.mxu1 %v4101_v10 }
 0x2be   : > { %3864 = vmatmul.mubr.msk.bf16.gmra.mrb[36].mxu1 %vm783_vm0, %v4958_v14  ;;  %3976 = vmatmul.mubr.msk.bf16.gmra.mrb[68].mxu0 %vm783_vm0, %v4983_v56 }
 0x2bf   : > { %3867 = vmatprep.mubr.msk.bf16.mxu1 %vm783_vm0, %v4971_v18  ;;  %3979 = vmatprep.mubr.msk.bf16.mxu0 %vm783_vm0, %v4995_v35 }
 0x2c6   : > { %3868 = vmatmul.mubr.msk.bf16.gmra.mrb[40].mxu1 %vm783_vm0, %v4983_v56  ;;  %3980 = vmatmul.mubr.msk.bf16.gmra.mrb[72].mxu0 %vm783_vm0, %v5007_v23 }
 0x2c7   : > { %3871 = vmatprep.mubr.msk.bf16.mxu1 %vm783_vm0, %v4995_v35  ;;  %3983 = vmatprep.mubr.msk.bf16.mxu0 %vm783_vm0, %v5019_v15 }
 0x2ce   : > { %3872 = vmatmul.mubr.msk.bf16.gmra.mrb[44].mxu1 %vm783_vm0, %v5007_v23  ;;  %3984 = vmatmul.mubr.msk.bf16.gmra.mrb[76].mxu0 %vm783_vm0, %v5031_v22 }
 0x2cf   : > { %3875 = vmatprep.mubr.msk.bf16.mxu1 %vm783_vm0, %v5019_v15  ;;  %3987 = vmatprep.mubr.msk.bf16.mxu0 %vm783_vm0, %v5043_v59 }
 0x2d6   : > { %3876 = vmatmul.mubr.msk.bf16.gmra.mrb[48].mxu1 %vm783_vm0, %v5031_v22  ;;  %3988 = vmatmul.mubr.msk.bf16.gmra.mrb[80].mxu0 %vm783_vm0, %v5055_v27 }
 0x2d7   : > { %3879 = vmatprep.mubr.msk.bf16.mxu1 %vm783_vm0, %v5043_v59  ;;  %3991 = vmatprep.mubr.msk.bf16.mxu0 %vm783_vm0, %v5067_v41 }
 0x2de   : > { %3880 = vmatmul.mubr.msk.bf16.gmra.mrb[52].mxu1 %vm783_vm0, %v5055_v27  ;;  %3992 = vmatmul.mubr.msk.bf16.gmra.mrb[84].mxu0 %vm783_vm0, %v5079_v49 }
 0x2df   : > { %3883 = vmatprep.mubr.msk.bf16.mxu1 %vm783_vm0, %v5067_v41  ;;  %3995 = vmatprep.mubr.msk.bf16.mxu0 %vm783_vm0, %v1293_v9 }
 0x2e6   : > { %3884 = vmatmul.mubr.msk.bf16.gmra.mrb[56].mxu1 %vm783_vm0, %v5079_v49  ;;  %3996 = vmatmul.mubr.msk.bf16.gmra.mrb[88].mxu0 %vm783_vm0, %v1294_v8 }
 0x2e7   : > { %3887 = vmatprep.mubr.msk.bf16.mxu1 %vm783_vm0, %v1293_v9 }
 0x2ee   : > { %3888 = vmatmul.mubr.msk.bf16.gmra.mrb[60].mxu1 %vm783_vm0, %v1294_v8 }
 0x2ef   : > { %3923 = vmatprep.mubr.msk.bf16.mxu1 %vm783_vm0, %v1293_v9 }
 0x2f6   : > { %3924 = vmatmul.mubr.msk.bf16.vlgmr.msra.gmra.mrb[64].mxu1 %vm783_vm0, %v1294_v8 }
 0x2f7   : > { %3928 = vmatpush3.bf16.msra.mxu1 %v4101_v10  ;;  %3931 = vmatprep.mubr.msk.bf16.mxu1 %vm783_vm0, %v4914_v26  ;;  %v5205_v26 = vld [vmem:[%s5705_s6] ss:$0 sm:$0xff] }
 0x2f8   : > { %3929 = vmatprep.subr.bf16.mxu1 %v4102_v61 }
 0x2fb   : > { %3930 = vmatpush3.bf16.msra.mxu1 %v4102_v61 }
 0x2fe   : > { %3932 = vmatmul.mubr.msk.bf16.vlgmr.msra.gmra.mrb[68].mxu1 %vm783_vm0, %v4926_v52 }
 0x2ff   : > { %3935 = vmatprep.mubr.msk.bf16.mxu1 %vm783_vm0, %v4946_v5 }
 0x306   : > { %3936 = vmatmul.mubr.msk.bf16.gmra.mrb[72].mxu1 %vm783_vm0, %v4958_v14 }
 0x307   : > { %3939 = vmatprep.mubr.msk.bf16.mxu1 %vm783_vm0, %v4971_v18 }
 0x30e   : > { %3940 = vmatmul.mubr.msk.bf16.gmra.mrb[76].mxu1 %vm783_vm0, %v4983_v56 }
 0x30f   : > { %3943 = vmatprep.mubr.msk.bf16.mxu1 %vm783_vm0, %v4995_v35 }
 0x316   : > { %3944 = vmatmul.mubr.msk.bf16.gmra.mrb[80].mxu1 %vm783_vm0, %v5007_v23 }
 0x317   : > { %3947 = vmatprep.mubr.msk.bf16.mxu1 %vm783_vm0, %v5019_v15 }
 0x31e   : > { %3948 = vmatmul.mubr.msk.bf16.gmra.mrb[84].mxu1 %vm783_vm0, %v5031_v22 }
 0x31f   : > { %3951 = vmatprep.mubr.msk.bf16.mxu1 %vm783_vm0, %v5043_v59 }
 0x326   : > { %3952 = vmatmul.mubr.msk.bf16.gmra.mrb[88].mxu1 %vm783_vm0, %v5055_v27 }
 0x327   : > { %3955 = vmatprep.mubr.msk.bf16.mxu1 %vm783_vm0, %v5067_v41 }
 0x32e   : > { %3956 = vmatmul.mubr.msk.bf16.gmra.mrb[92].mxu1 %vm783_vm0, %v5079_v49 }
 0x32f   : > { %3959 = vmatprep.mubr.msk.bf16.mxu1 %vm783_vm0, %v1293_v9 }
 0x336   : > { %3960 = vmatmul.mubr.msk.bf16.gmra.mrb[96].mxu1 %vm783_vm0, %v1294_v8 }
 0x349   : > { %v3825_v60 = vpop.f32.mrb[0].mxu1  ;;  %v3897_v52 = vpop.f32.mrb[32].mxu0 }
 0x34a   : > { %v2015_v5 = vadd.f32 %v3897_v52, %v5200_v29  ;;  %v1400_v14 = vpop.f32.mrb[1].mxu1  ;;  %v2006_v18 = vpop.f32.mrb[33].mxu0  ;;  %v1409_v15 = vadd.f32 %v3825_v60, %v5205_v26 }
 0x34b   : > { %v2007_v56 = vadd.f32 %v5200_v29, %v2006_v18  ;;  %v3826_v35 = vpop.f32.mrb[2].mxu1  ;;  %v3898_v23 = vpop.f32.mrb[34].mxu0  ;;  %v1401_v16 = vadd.f32 %v5205_v26, %v1400_v14 }
 0x34c   : > { %v3562_v22 = vpack.c.bf16 %v2015_v5, %v2015_v5  ;;  %v1412_v17 = vadd.f32 %v3826_v35, %v5205_v26  ;;  %v2018_v47 = vadd.f32 %v3898_v23, %v5200_v29  ;;  %v1403_v39 = vpop.f32.mrb[3].mxu1  ;;  %v2009_v51 = vpop.f32.mrb[35].mxu0 }
 0x34d   : > { %v3560_v32 = vpack.c.bf16 %v2007_v56, %v2007_v56  ;;  %v1404_v42 = vadd.f32 %v5205_v26, %v1403_v39  ;;  %v2010_v3 = vadd.f32 %v5200_v29, %v2009_v51 }
 0x34e   : > { %3315 = vst.msk [vmem:[%s5211_s25 + $0x88] sm:$0xf] %vm1914_vm1, %v3562_v22  ;;  %v1528_v37 = vpack.c.bf16 %v1412_v17, %v1409_v15  ;;  %v3563_v31 = vpack.c.bf16 %v2018_v47, %v2018_v47 }
 0x34f   : > { %3313 = vst.msk [vmem:[%s5211_s25 + $0x80] sm:$0xf] %vm1914_vm1, %v3560_v32  ;;  %v3561_v13 = vpack.c.bf16 %v2010_v3, %v2010_v3  ;;  %v1527_v59 = vpack.c.bf16 %v1404_v42, %v1401_v16 }
 0x350   : > { %3316 = vst.msk [vmem:[%s5211_s25 + $0x8c] sm:$0xf] %vm1914_vm1, %v3563_v31 }
 0x351   : > { %3314 = vst.msk [vmem:[%s5211_s25 + $0x84] sm:$0xf] %vm1914_vm1, %v3561_v13  ;;  %1543 = vxpose.xlu0.c.b16.start [1/8] (narrow) %v1527_v59, 32  ;;  %v3829_v45 = vpop.f32.mrb[4].mxu1  ;;  %v3901_v19 = vpop.f32.mrb[36].mxu0 }
 0x352   : > { %v2031_v21 = vadd.f32 %v3901_v19, %v5200_v29  ;;  %v1416_v7 = vpop.f32.mrb[5].mxu1  ;;  %v2022_v44 = vpop.f32.mrb[37].mxu0  ;;  %v1425_v6 = vadd.f32 %v3829_v45, %v5205_v26 }
 0x353   : > { %v2023_v50 = vadd.f32 %v5200_v29, %v2022_v44  ;;  %v3830_v25 = vpop.f32.mrb[6].mxu1  ;;  %v3902_v0 = vpop.f32.mrb[38].mxu0  ;;  %v1417_v40 = vadd.f32 %v5205_v26, %v1416_v7 }
 0x354   : > { %v3566_v27 = vpack.c.bf16 %v2031_v21, %v2031_v21  ;;  %v1428_v28 = vadd.f32 %v3830_v25, %v5205_v26  ;;  %v2034_v55 = vadd.f32 %v3902_v0, %v5200_v29  ;;  %v1419_v12 = vpop.f32.mrb[7].mxu1  ;;  %v2025_v38 = vpop.f32.mrb[39].mxu0 }
 0x355   : > { %v3564_v54 = vpack.c.bf16 %v2023_v50, %v2023_v50  ;;  %v1420_v34 = vadd.f32 %v5205_v26, %v1419_v12  ;;  %v2026_v36 = vadd.f32 %v5200_v29, %v2025_v38  ;;  %1544 = vxpose.xlu0.c.b16.cont [2/8] (narrow) %v1528_v37, 32 }
 0x356   : > { %3319 = vst.msk [vmem:[%s5211_s25 + $0x98] sm:$0xf] %vm1914_vm1, %v3566_v27  ;;  %v1530_v41 = vpack.c.bf16 %v1428_v28, %v1425_v6  ;;  %v3567_v33 = vpack.c.bf16 %v2034_v55, %v2034_v55 }
 0x357   : > { %3317 = vst.msk [vmem:[%s5211_s25 + $0x90] sm:$0xf] %vm1914_vm1, %v3564_v54  ;;  %v1529_v30 = vpack.c.bf16 %v1420_v34, %v1417_v40  ;;  %v3565_v46 = vpack.c.bf16 %v2026_v36, %v2026_v36 }
 0x358   : > { %3320 = vst.msk [vmem:[%s5211_s25 + $0x9c] sm:$0xf] %vm1914_vm1, %v3567_v33 }
 0x359   : > { %3318 = vst.msk [vmem:[%s5211_s25 + $0x94] sm:$0xf] %vm1914_vm1, %v3565_v46  ;;  %1545 = vxpose.xlu0.c.b16.cont [3/8] (narrow) %v1529_v30, 32  ;;  %v3833_v57 = vpop.f32.mrb[8].mxu1  ;;  %v3905_v20 = vpop.f32.mrb[40].mxu0 }
 0x35a   : > { %v2047_v62 = vadd.f32 %v3905_v20, %v5200_v29  ;;  %v1432_v63 = vpop.f32.mrb[9].mxu1  ;;  %v2038_v24 = vpop.f32.mrb[41].mxu0  ;;  %v1441_v11 = vadd.f32 %v3833_v57, %v5205_v26 }
 0x35b   : > { %v2039_v49 = vadd.f32 %v5200_v29, %v2038_v24  ;;  %v3834_v53 = vpop.f32.mrb[10].mxu1  ;;  %v3906_v48 = vpop.f32.mrb[42].mxu0  ;;  %v1433_v1 = vadd.f32 %v5205_v26, %v1432_v63 }
 0x35c   : > { %v3570_v58 = vpack.c.bf16 %v2047_v62, %v2047_v62  ;;  %v1444_v4 = vadd.f32 %v3834_v53, %v5205_v26  ;;  %v2050_v2 = vadd.f32 %v3906_v48, %v5200_v29  ;;  %v1435_v9 = vpop.f32.mrb[11].mxu1  ;;  %v2041_v43 = vpop.f32.mrb[43].mxu0 }
 0x35d   : > { %v3568_v8 = vpack.c.bf16 %v2039_v49, %v2039_v49  ;;  %v1436_v10 = vadd.f32 %v5205_v26, %v1435_v9  ;;  %v2042_v61 = vadd.f32 %v5200_v29, %v2041_v43  ;;  %1546 = vxpose.xlu0.c.b16.cont [4/8] (narrow) %v1530_v41, 32 }
 0x35e   : > { %3323 = vst.msk [vmem:[%s5211_s25 + $0xa8] sm:$0xf] %vm1914_vm1, %v3570_v58  ;;  %v1532_v60 = vpack.c.bf16 %v1444_v4, %v1441_v11  ;;  %v3571_v52 = vpack.c.bf16 %v2050_v2, %v2050_v2 }
 0x35f   : > { %3321 = vst.msk [vmem:[%s5211_s25 + $0xa0] sm:$0xf] %vm1914_vm1, %v3568_v8  ;;  %v1531_v5 = vpack.c.bf16 %v1436_v10, %v1433_v1  ;;  %v3569_v14 = vpack.c.bf16 %v2042_v61, %v2042_v61 }
 0x360   : > { %3324 = vst.msk [vmem:[%s5211_s25 + $0xac] sm:$0xf] %vm1914_vm1, %v3571_v52 }
 0x361   : > { %3322 = vst.msk [vmem:[%s5211_s25 + $0xa4] sm:$0xf] %vm1914_vm1, %v3569_v14  ;;  %1547 = vxpose.xlu0.c.b16.cont [5/8] (narrow) %v1531_v5, 32  ;;  %v3837_v18 = vpop.f32.mrb[12].mxu1  ;;  %v3909_v56 = vpop.f32.mrb[44].mxu0 }
 0x362   : > { %v2063_v35 = vadd.f32 %v3909_v56, %v5200_v29  ;;  %v1448_v23 = vpop.f32.mrb[13].mxu1  ;;  %v2054_v15 = vpop.f32.mrb[45].mxu0  ;;  %v1457_v39 = vadd.f32 %v3837_v18, %v5205_v26 }
 0x363   : > { %v2055_v22 = vadd.f32 %v5200_v29, %v2054_v15  ;;  %v3838_v17 = vpop.f32.mrb[14].mxu1  ;;  %v3910_v47 = vpop.f32.mrb[46].mxu0  ;;  %v1449_v37 = vadd.f32 %v5205_v26, %v1448_v23 }
 0x364   : > { %v3574_v51 = vpack.c.bf16 %v2063_v35, %v2063_v35  ;;  %v1460_v16 = vadd.f32 %v3838_v17, %v5205_v26  ;;  %v2066_v32 = vadd.f32 %v3910_v47, %v5200_v29  ;;  %v1451_v42 = vpop.f32.mrb[15].mxu1  ;;  %v2057_v3 = vpop.f32.mrb[47].mxu0 }
 0x365   : > { %v3572_v31 = vpack.c.bf16 %v2055_v22, %v2055_v22  ;;  %v1452_v13 = vadd.f32 %v5205_v26, %v1451_v42  ;;  %v2058_v59 = vadd.f32 %v5200_v29, %v2057_v3  ;;  %1548 = vxpose.xlu0.c.b16.cont [6/8] (narrow) %v1532_v60, 32 }
 0x366   : > { %3327 = vst.msk [vmem:[%s5211_s25 + $0xb8] sm:$0xf] %vm1914_vm1, %v3574_v51  ;;  %v1534_v45 = vpack.c.bf16 %v1460_v16, %v1457_v39  ;;  %v3575_v19 = vpack.c.bf16 %v2066_v32, %v2066_v32 }
 0x367   : > { %3325 = vst.msk [vmem:[%s5211_s25 + $0xb0] sm:$0xf] %vm1914_vm1, %v3572_v31  ;;  %v1533_v21 = vpack.c.bf16 %v1452_v13, %v1449_v37  ;;  %v3573_v7 = vpack.c.bf16 %v2058_v59, %v2058_v59 }
 0x368   : > { %3328 = vst.msk [vmem:[%s5211_s25 + $0xbc] sm:$0xf] %vm1914_vm1, %v3575_v19 }
 0x369   : > { %3326 = vst.msk [vmem:[%s5211_s25 + $0xb4] sm:$0xf] %vm1914_vm1, %v3573_v7  ;;  %1549 = vxpose.xlu0.c.b16.cont [7/8] (narrow) %v1533_v21, 32  ;;  %v3841_v44 = vpop.f32.mrb[16].mxu1  ;;  %v3913_v50 = vpop.f32.mrb[48].mxu0 }
 0x36a   : > { %v2079_v25 = vadd.f32 %v3913_v50, %v5200_v29  ;;  %v1464_v0 = vpop.f32.mrb[17].mxu1  ;;  %v2070_v6 = vpop.f32.mrb[49].mxu0  ;;  %v1473_v12 = vadd.f32 %v3841_v44, %v5205_v26 }
 0x36b   : > { %v2071_v27 = vadd.f32 %v5200_v29, %v2070_v6  ;;  %v3842_v28 = vpop.f32.mrb[18].mxu1  ;;  %v3914_v55 = vpop.f32.mrb[50].mxu0  ;;  %v1465_v41 = vadd.f32 %v5205_v26, %v1464_v0  ;;  %v5323_v6 = vld [vmem:[%s5707_s8 + $0x3] ss:$0 sm:$0xff] }
 0x36c   : > { %v3578_v38 = vpack.c.bf16 %v2079_v25, %v2079_v25  ;;  %v1476_v40 = vadd.f32 %v3842_v28, %v5205_v26  ;;  %v2082_v54 = vadd.f32 %v3914_v55, %v5200_v29  ;;  %v1467_v34 = vpop.f32.mrb[19].mxu1  ;;  %v2073_v36 = vpop.f32.mrb[51].mxu0 }
 0x36d   : > { %v3576_v33 = vpack.c.bf16 %v2071_v27, %v2071_v27  ;;  %v1468_v30 = vadd.f32 %v5205_v26, %v1467_v34  ;;  %v2074_v46 = vadd.f32 %v5200_v29, %v2073_v36  ;;  %1550 = vxpose.xlu0.c.b16.end [8/8] (narrow) %v1534_v45, 32 }
 0x36e   : > { %3331 = vst.msk [vmem:[%s5211_s25 + $0xc8] sm:$0xf] %vm1914_vm1, %v3578_v38  ;;  %v1536_v57 = vpack.c.bf16 %v1476_v40, %v1473_v12  ;;  %v3579_v20 = vpack.c.bf16 %v2082_v54, %v2082_v54 }
 0x36f   : > { %3329 = vst.msk [vmem:[%s5211_s25 + $0xc0] sm:$0xf] %vm1914_vm1, %v3576_v33  ;;  %v3577_v62 = vpack.c.bf16 %v2074_v46, %v2074_v46  ;;  %v1535_v63 = vpack.c.bf16 %v1468_v30, %v1465_v41 }
 0x370   : > { %3332 = vst.msk [vmem:[%s5211_s25 + $0xcc] sm:$0xf] %vm1914_vm1, %v3579_v20 }
 0x371   : > { %3330 = vst.msk [vmem:[%s5211_s25 + $0xc4] sm:$0xf] %vm1914_vm1, %v3577_v62  ;;  %1559 = vxpose.xlu1.c.b16.start [1/8] (narrow) %v1535_v63, 32  ;;  %v3845_v24 = vpop.f32.mrb[20].mxu1  ;;  %v3917_v49 = vpop.f32.mrb[52].mxu0 }
 0x372   : > { %v2095_v53 = vadd.f32 %v3917_v49, %v5200_v29  ;;  %v1480_v48 = vpop.f32.mrb[21].mxu1  ;;  %v2086_v11 = vpop.f32.mrb[53].mxu0  ;;  %v1489_v9 = vadd.f32 %v3845_v24, %v5205_v26 }
 0x373   : > { %v2087_v58 = vadd.f32 %v5200_v29, %v2086_v11  ;;  %v3846_v4 = vpop.f32.mrb[22].mxu1  ;;  %v3918_v2 = vpop.f32.mrb[54].mxu0  ;;  %v1481_v60 = vadd.f32 %v5205_v26, %v1480_v48 }
 0x374   : > { %v3582_v43 = vpack.c.bf16 %v2095_v53, %v2095_v53  ;;  %v1492_v1 = vadd.f32 %v3846_v4, %v5205_v26  ;;  %v2098_v8 = vadd.f32 %v3918_v2, %v5200_v29  ;;  %v1483_v10 = vpop.f32.mrb[23].mxu1  ;;  %v2089_v61 = vpop.f32.mrb[55].mxu0 }
 0x375   : > { %v3580_v52 = vpack.c.bf16 %v2087_v58, %v2087_v58  ;;  %v1484_v5 = vadd.f32 %v5205_v26, %v1483_v10  ;;  %v2090_v14 = vadd.f32 %v5200_v29, %v2089_v61  ;;  %1560 = vxpose.xlu1.c.b16.cont [2/8] (narrow) %v1536_v57, 32  ;;  %v5344_v58 = vld [vmem:[%s5707_s8] ss:$0 sm:$0xff] }
 0x376   : > { %3335 = vst.msk [vmem:[%s5211_s25 + $0xd8] sm:$0xf] %vm1914_vm1, %v3582_v43  ;;  %v1538_v18 = vpack.c.bf16 %v1492_v1, %v1489_v9  ;;  %v3583_v56 = vpack.c.bf16 %v2098_v8, %v2098_v8 }
 0x377   : > { %3333 = vst.msk [vmem:[%s5211_s25 + $0xd0] sm:$0xf] %vm1914_vm1, %v3580_v52  ;;  %v1537_v35 = vpack.c.bf16 %v1484_v5, %v1481_v60  ;;  %v3581_v23 = vpack.c.bf16 %v2090_v14, %v2090_v14 }
 0x378   : > { %3336 = vst.msk [vmem:[%s5211_s25 + $0xdc] sm:$0xf] %vm1914_vm1, %v3583_v56 }
 0x379   : > { %3334 = vst.msk [vmem:[%s5211_s25 + $0xd4] sm:$0xf] %vm1914_vm1, %v3581_v23  ;;  %1561 = vxpose.xlu1.c.b16.cont [3/8] (narrow) %v1537_v35, 32  ;;  %v3849_v15 = vpop.f32.mrb[24].mxu1  ;;  %v3921_v22 = vpop.f32.mrb[56].mxu0 }
 0x37a   : > { %v2111_v17 = vadd.f32 %v3921_v22, %v5200_v29  ;;  %v1496_v47 = vpop.f32.mrb[25].mxu1  ;;  %v2102_v39 = vpop.f32.mrb[57].mxu0  ;;  %v1505_v42 = vadd.f32 %v3849_v15, %v5205_v26 }
 0x37b   : > { %v2103_v51 = vadd.f32 %v5200_v29, %v2102_v39  ;;  %v3850_v16 = vpop.f32.mrb[26].mxu1  ;;  %v3922_v32 = vpop.f32.mrb[58].mxu0  ;;  %v1497_v45 = vadd.f32 %v5205_v26, %v1496_v47 }
 0x37c   : > { %v3586_v3 = vpack.c.bf16 %v2111_v17, %v2111_v17  ;;  %v1508_v37 = vadd.f32 %v3850_v16, %v5205_v26  ;;  %v2114_v31 = vadd.f32 %v3922_v32, %v5200_v29  ;;  %v1499_v13 = vpop.f32.mrb[27].mxu1  ;;  %v2105_v59 = vpop.f32.mrb[59].mxu0 }
 0x37d   : > { %v3584_v19 = vpack.c.bf16 %v2103_v51, %v2103_v51  ;;  %v1500_v21 = vadd.f32 %v5205_v26, %v1499_v13  ;;  %v2106_v7 = vadd.f32 %v5200_v29, %v2105_v59  ;;  %1562 = vxpose.xlu1.c.b16.cont [4/8] (narrow) %v1538_v18, 32 }
 0x37e   : > { %3339 = vst.msk [vmem:[%s5211_s25 + $0xe8] sm:$0xf] %vm1914_vm1, %v3586_v3  ;;  %v1540_v44 = vpack.c.bf16 %v1508_v37, %v1505_v42  ;;  %v3587_v50 = vpack.c.bf16 %v2114_v31, %v2114_v31 }
 0x37f   : > { %3337 = vst.msk [vmem:[%s5211_s25 + $0xe0] sm:$0xf] %vm1914_vm1, %v3584_v19  ;;  %v1539_v25 = vpack.c.bf16 %v1500_v21, %v1497_v45  ;;  %v3585_v0 = vpack.c.bf16 %v2106_v7, %v2106_v7 }
 0x380   : > { %3340 = vst.msk [vmem:[%s5211_s25 + $0xec] sm:$0xf] %vm1914_vm1, %v3587_v50 }
 0x381   : > { %3338 = vst.msk [vmem:[%s5211_s25 + $0xe4] sm:$0xf] %vm1914_vm1, %v3585_v0  ;;  %v3969_v27 = vpop.f32.mrb[60].mxu0  ;;  %1563 = vxpose.xlu1.c.b16.cont [5/8] (narrow) %v1539_v25, 32  ;;  %v3853_v28 = vpop.f32.mrb[28].mxu1 }
 0x382   : > { %v2709_v55 = vadd.f32 %v3969_v27, %v5323_v6  ;;  %v1512_v12 = vpop.f32.mrb[29].mxu1  ;;  %v2700_v38 = vpop.f32.mrb[61].mxu0  ;;  %v1521_v41 = vadd.f32 %v3853_v28, %v5205_v26 }
 0x383   : > { %v2701_v40 = vadd.f32 %v5323_v6, %v2700_v38  ;;  %v3854_v54 = vpop.f32.mrb[30].mxu1  ;;  %v3970_v34 = vpop.f32.mrb[62].mxu0  ;;  %v1513_v20 = vadd.f32 %v5205_v26, %v1512_v12 }
 0x384   : > { %v3626_v36 = vpack.c.bf16 %v2709_v55, %v2709_v55  ;;  %v1524_v33 = vadd.f32 %v3854_v54, %v5205_v26  ;;  %v2712_v30 = vadd.f32 %v3970_v34, %v5323_v6  ;;  %v1515_v46 = vpop.f32.mrb[31].mxu1  ;;  %v2703_v57 = vpop.f32.mrb[63].mxu0 }
 0x385   : > { %v3624_v62 = vpack.c.bf16 %v2701_v40, %v2701_v40  ;;  %v1516_v63 = vadd.f32 %v5205_v26, %v1515_v46  ;;  %v2704_v24 = vadd.f32 %v5323_v6, %v2703_v57  ;;  %1564 = vxpose.xlu1.c.b16.cont [6/8] (narrow) %v1540_v44, 32 }
 0x386   : > { %3491 = vst.msk [vmem:[%s5211_s25 + $0x188] sm:$0xf] %vm1914_vm1, %v3626_v36  ;;  %v1542_v49 = vpack.c.bf16 %v1524_v33, %v1521_v41  ;;  %v3627_v53 = vpack.c.bf16 %v2712_v30, %v2712_v30 }
 0x387   : > { %3489 = vst.msk [vmem:[%s5211_s25 + $0x180] sm:$0xf] %vm1914_vm1, %v3624_v62  ;;  %v1541_v48 = vpack.c.bf16 %v1516_v63, %v1513_v20  ;;  %v3625_v11 = vpack.c.bf16 %v2704_v24, %v2704_v24 }
 0x388   : > { %3492 = vst.msk [vmem:[%s5211_s25 + $0x18c] sm:$0xf] %vm1914_vm1, %v3627_v53 }
 0x389   : > { %3490 = vst.msk [vmem:[%s5211_s25 + $0x184] sm:$0xf] %vm1914_vm1, %v3625_v11  ;;  %v3861_v26 = vpop.f32.mrb[32].mxu1  ;;  %v3973_v4 = vpop.f32.mrb[64].mxu0  ;;  %1565 = vxpose.xlu1.c.b16.cont [7/8] (narrow) %v1541_v48, 32 }
 0x38a   : > { %v1668_v2 = vadd.f32 %v3861_v26, %v5344_v58  ;;  %v2725_v9 = vadd.f32 %v3973_v4, %v5323_v6  ;;  %v1659_v43 = vpop.f32.mrb[33].mxu1  ;;  %v2716_v1 = vpop.f32.mrb[65].mxu0 }
 0x38b   : > { %v1660_v8 = vadd.f32 %v5344_v58, %v1659_v43  ;;  %v2717_v10 = vadd.f32 %v5323_v6, %v2716_v1  ;;  %v3862_v61 = vpop.f32.mrb[34].mxu1  ;;  %v3974_v60 = vpop.f32.mrb[66].mxu0 }
 0x38c   : > { %v3530_v52 = vpack.c.bf16 %v1668_v2, %v1668_v2  ;;  %v3630_v5 = vpack.c.bf16 %v2725_v9, %v2725_v9  ;;  %v1671_v14 = vadd.f32 %v3862_v61, %v5344_v58  ;;  %v2728_v18 = vadd.f32 %v3974_v60, %v5323_v6  ;;  %v1662_v56 = vpop.f32.mrb[35].mxu1  ;;  %v2719_v35 = vpop.f32.mrb[67].mxu0 }
 0x38d   : > { %v3528_v23 = vpack.c.bf16 %v1660_v8, %v1660_v8  ;;  %v3628_v15 = vpack.c.bf16 %v2717_v10, %v2717_v10  ;;  %v1663_v22 = vadd.f32 %v5344_v58, %v1662_v56  ;;  %v2720_v17 = vadd.f32 %v5323_v6, %v2719_v35  ;;  %1566 = vxpose.xlu1.c.b16.end [8/8] (narrow) %v1542_v49, 32 }
 0x38e   : > { %1917 = vst.msk [vmem:[%s5211_s25 + $0x8] sm:$0xf] %vm1914_vm1, %v3530_v52  ;;  %3495 = vst.msk [vmem:[%s5211_s25 + $0x198] sm:$0xf] %vm1914_vm1, %v3630_v5  ;;  %v3531_v47 = vpack.c.bf16 %v1671_v14, %v1671_v14  ;;  %v3631_v39 = vpack.c.bf16 %v2728_v18, %v2728_v18 }
 0x38f   : > { %1915 = vst.msk [vmem:[%s5211_s25] sm:$0xf] %vm1914_vm1, %v3528_v23  ;;  %3493 = vst.msk [vmem:[%s5211_s25 + $0x190] sm:$0xf] %vm1914_vm1, %v3628_v15  ;;  %v3529_v51 = vpack.c.bf16 %v1663_v22, %v1663_v22  ;;  %v3629_v16 = vpack.c.bf16 %v2720_v17, %v2720_v17 }
 0x390   : > { %1918 = vst.msk [vmem:[%s5211_s25 + $0xc] sm:$0xf] %vm1914_vm1, %v3531_v47  ;;  %3496 = vst.msk [vmem:[%s5211_s25 + $0x19c] sm:$0xf] %vm1914_vm1, %v3631_v39 }
 0x391   : > { %1916 = vst.msk [vmem:[%s5211_s25 + $0x4] sm:$0xf] %vm1914_vm1, %v3529_v51  ;;  %3494 = vst.msk [vmem:[%s5211_s25 + $0x194] sm:$0xf] %vm1914_vm1, %v3629_v16  ;;  %v3865_v32 = vpop.f32.mrb[36].mxu1  ;;  %v3977_v42 = vpop.f32.mrb[68].mxu0 }
 0x392   : > { %v1684_v3 = vadd.f32 %v3865_v32, %v5344_v58  ;;  %v2741_v37 = vadd.f32 %v3977_v42, %v5323_v6  ;;  %v1675_v31 = vpop.f32.mrb[37].mxu1  ;;  %v2732_v13 = vpop.f32.mrb[69].mxu0 }
 0x393   : > { %v1676_v59 = vadd.f32 %v5344_v58, %v1675_v31  ;;  %v2733_v45 = vadd.f32 %v5323_v6, %v2732_v13  ;;  %v3866_v19 = vpop.f32.mrb[38].mxu1  ;;  %v3978_v21 = vpop.f32.mrb[70].mxu0 }
 0x394   : > { %v3534_v7 = vpack.c.bf16 %v1684_v3, %v1684_v3  ;;  %v3634_v44 = vpack.c.bf16 %v2741_v37, %v2741_v37  ;;  %v1687_v50 = vadd.f32 %v3866_v19, %v5344_v58  ;;  %v2744_v25 = vadd.f32 %v3978_v21, %v5323_v6  ;;  %v1678_v0 = vpop.f32.mrb[39].mxu1  ;;  %v2735_v27 = vpop.f32.mrb[71].mxu0 }
 0x395   : > { %v3532_v28 = vpack.c.bf16 %v1676_v59, %v1676_v59  ;;  %v3632_v55 = vpack.c.bf16 %v2733_v45, %v2733_v45  ;;  %v1679_v12 = vadd.f32 %v5344_v58, %v1678_v0  ;;  %v2736_v38 = vadd.f32 %v5323_v6, %v2735_v27 }
 0x396   : > { %1921 = vst.msk [vmem:[%s5211_s25 + $0x18] sm:$0xf] %vm1914_vm1, %v3534_v7  ;;  %3499 = vst.msk [vmem:[%s5211_s25 + $0x1a8] sm:$0xf] %vm1914_vm1, %v3634_v44  ;;  %v3535_v40 = vpack.c.bf16 %v1687_v50, %v1687_v50  ;;  %v3635_v54 = vpack.c.bf16 %v2744_v25, %v2744_v25 }
 0x397   : > { %1919 = vst.msk [vmem:[%s5211_s25 + $0x10] sm:$0xf] %vm1914_vm1, %v3532_v28  ;;  %3497 = vst.msk [vmem:[%s5211_s25 + $0x1a0] sm:$0xf] %vm1914_vm1, %v3632_v55  ;;  %v3533_v34 = vpack.c.bf16 %v1679_v12, %v1679_v12  ;;  %v3633_v36 = vpack.c.bf16 %v2736_v38, %v2736_v38 }
 0x398   : > { %1922 = vst.msk [vmem:[%s5211_s25 + $0x1c] sm:$0xf] %vm1914_vm1, %v3535_v40  ;;  %3500 = vst.msk [vmem:[%s5211_s25 + $0x1ac] sm:$0xf] %vm1914_vm1, %v3635_v54 }
 0x399   : > { %1920 = vst.msk [vmem:[%s5211_s25 + $0x14] sm:$0xf] %vm1914_vm1, %v3533_v34  ;;  %3498 = vst.msk [vmem:[%s5211_s25 + $0x1a4] sm:$0xf] %vm1914_vm1, %v3633_v36  ;;  %v3869_v41 = vpop.f32.mrb[40].mxu1  ;;  %v3981_v33 = vpop.f32.mrb[72].mxu0 }
 0x39a   : > { %v1700_v30 = vadd.f32 %v3869_v41, %v5344_v58  ;;  %v2757_v46 = vadd.f32 %v3981_v33, %v5323_v6  ;;  %v1691_v57 = vpop.f32.mrb[41].mxu1  ;;  %v2748_v20 = vpop.f32.mrb[73].mxu0 }
 0x39b   : > { %v1692_v62 = vadd.f32 %v5344_v58, %v1691_v57  ;;  %v2749_v63 = vadd.f32 %v5323_v6, %v2748_v20  ;;  %v3870_v24 = vpop.f32.mrb[42].mxu1  ;;  %v3982_v49 = vpop.f32.mrb[74].mxu0 }
 0x39c   : > { %v3538_v53 = vpack.c.bf16 %v1700_v30, %v1700_v30  ;;  %v3638_v48 = vpack.c.bf16 %v2757_v46, %v2757_v46  ;;  %v1703_v11 = vadd.f32 %v3870_v24, %v5344_v58  ;;  %v2760_v26 = vadd.f32 %v3982_v49, %v5323_v6  ;;  %v1694_v4 = vpop.f32.mrb[43].mxu1  ;;  %v2751_v2 = vpop.f32.mrb[75].mxu0 }
 0x39d   : > { %v3536_v9 = vpack.c.bf16 %v1692_v62, %v1692_v62  ;;  %v3636_v43 = vpack.c.bf16 %v2749_v63, %v2749_v63  ;;  %v1695_v1 = vadd.f32 %v5344_v58, %v1694_v4  ;;  %v2752_v8 = vadd.f32 %v5323_v6, %v2751_v2 }
 0x39e   : > { %1925 = vst.msk [vmem:[%s5211_s25 + $0x28] sm:$0xf] %vm1914_vm1, %v3538_v53  ;;  %3503 = vst.msk [vmem:[%s5211_s25 + $0x1b8] sm:$0xf] %vm1914_vm1, %v3638_v48  ;;  %v3539_v10 = vpack.c.bf16 %v1703_v11, %v1703_v11  ;;  %v3639_v61 = vpack.c.bf16 %v2760_v26, %v2760_v26 }
 0x39f   : > { %1923 = vst.msk [vmem:[%s5211_s25 + $0x20] sm:$0xf] %vm1914_vm1, %v3536_v9  ;;  %3501 = vst.msk [vmem:[%s5211_s25 + $0x1b0] sm:$0xf] %vm1914_vm1, %v3636_v43  ;;  %v3537_v60 = vpack.c.bf16 %v1695_v1, %v1695_v1  ;;  %v3637_v52 = vpack.c.bf16 %v2752_v8, %v2752_v8 }
 0x3a0   : > { %1926 = vst.msk [vmem:[%s5211_s25 + $0x2c] sm:$0xf] %vm1914_vm1, %v3539_v10  ;;  %3504 = vst.msk [vmem:[%s5211_s25 + $0x1bc] sm:$0xf] %vm1914_vm1, %v3639_v61 }
 0x3a1   : > { %1924 = vst.msk [vmem:[%s5211_s25 + $0x24] sm:$0xf] %vm1914_vm1, %v3537_v60  ;;  %3502 = vst.msk [vmem:[%s5211_s25 + $0x1b4] sm:$0xf] %vm1914_vm1, %v3637_v52  ;;  %v3873_v5 = vpop.f32.mrb[44].mxu1  ;;  %v3985_v14 = vpop.f32.mrb[76].mxu0 }
 0x3a2   : > { %v1716_v18 = vadd.f32 %v3873_v5, %v5344_v58  ;;  %v2773_v56 = vadd.f32 %v3985_v14, %v5323_v6  ;;  %v1707_v35 = vpop.f32.mrb[45].mxu1  ;;  %v2764_v23 = vpop.f32.mrb[77].mxu0 }
 0x3a3   : > { %v1708_v15 = vadd.f32 %v5344_v58, %v1707_v35  ;;  %v2765_v22 = vadd.f32 %v5323_v6, %v2764_v23  ;;  %v3874_v17 = vpop.f32.mrb[46].mxu1  ;;  %v3986_v47 = vpop.f32.mrb[78].mxu0 }
 0x3a4   : > { %v3542_v39 = vpack.c.bf16 %v1716_v18, %v1716_v18  ;;  %v3642_v51 = vpack.c.bf16 %v2773_v56, %v2773_v56  ;;  %v1719_v16 = vadd.f32 %v3874_v17, %v5344_v58  ;;  %v2776_v32 = vadd.f32 %v3986_v47, %v5323_v6  ;;  %v1710_v42 = vpop.f32.mrb[47].mxu1  ;;  %v2767_v3 = vpop.f32.mrb[79].mxu0 }
 0x3a5   : > { %v3540_v37 = vpack.c.bf16 %v1708_v15, %v1708_v15  ;;  %v3640_v31 = vpack.c.bf16 %v2765_v22, %v2765_v22  ;;  %v1711_v13 = vadd.f32 %v5344_v58, %v1710_v42  ;;  %v2768_v59 = vadd.f32 %v5323_v6, %v2767_v3 }
 0x3a6   : > { %1929 = vst.msk [vmem:[%s5211_s25 + $0x38] sm:$0xf] %vm1914_vm1, %v3542_v39  ;;  %3507 = vst.msk [vmem:[%s5211_s25 + $0x1c8] sm:$0xf] %vm1914_vm1, %v3642_v51  ;;  %v3543_v45 = vpack.c.bf16 %v1719_v16, %v1719_v16  ;;  %v3643_v19 = vpack.c.bf16 %v2776_v32, %v2776_v32 }
 0x3a7   : > { %1927 = vst.msk [vmem:[%s5211_s25 + $0x30] sm:$0xf] %vm1914_vm1, %v3540_v37  ;;  %3505 = vst.msk [vmem:[%s5211_s25 + $0x1c0] sm:$0xf] %vm1914_vm1, %v3640_v31  ;;  %v3541_v21 = vpack.c.bf16 %v1711_v13, %v1711_v13  ;;  %v3641_v7 = vpack.c.bf16 %v2768_v59, %v2768_v59 }
 0x3a8   : > { %1930 = vst.msk [vmem:[%s5211_s25 + $0x3c] sm:$0xf] %vm1914_vm1, %v3543_v45  ;;  %3508 = vst.msk [vmem:[%s5211_s25 + $0x1cc] sm:$0xf] %vm1914_vm1, %v3643_v19 }
 0x3a9   : > { %1928 = vst.msk [vmem:[%s5211_s25 + $0x34] sm:$0xf] %vm1914_vm1, %v3541_v21  ;;  %3506 = vst.msk [vmem:[%s5211_s25 + $0x1c4] sm:$0xf] %vm1914_vm1, %v3641_v7  ;;  %v3877_v44 = vpop.f32.mrb[48].mxu1  ;;  %v3989_v50 = vpop.f32.mrb[80].mxu0 }
 0x3aa   : > { %v1732_v25 = vadd.f32 %v3877_v44, %v5344_v58  ;;  %v2789_v0 = vadd.f32 %v3989_v50, %v5323_v6  ;;  %v1723_v27 = vpop.f32.mrb[49].mxu1  ;;  %v2780_v28 = vpop.f32.mrb[81].mxu0 }
 0x3ab   : > { %v1724_v55 = vadd.f32 %v5344_v58, %v1723_v27  ;;  %v2781_v12 = vadd.f32 %v5323_v6, %v2780_v28  ;;  %v3878_v38 = vpop.f32.mrb[50].mxu1  ;;  %v3990_v40 = vpop.f32.mrb[82].mxu0 }
 0x3ac   : > { %v3546_v54 = vpack.c.bf16 %v1732_v25, %v1732_v25  ;;  %v3646_v34 = vpack.c.bf16 %v2789_v0, %v2789_v0  ;;  %v1735_v36 = vadd.f32 %v3878_v38, %v5344_v58  ;;  %v2792_v41 = vadd.f32 %v3990_v40, %v5323_v6  ;;  %v1726_v33 = vpop.f32.mrb[51].mxu1  ;;  %v2783_v30 = vpop.f32.mrb[83].mxu0 }
 0x3ad   : > { %v3544_v46 = vpack.c.bf16 %v1724_v55, %v1724_v55  ;;  %v3644_v57 = vpack.c.bf16 %v2781_v12, %v2781_v12  ;;  %v1727_v20 = vadd.f32 %v5344_v58, %v1726_v33  ;;  %v2784_v62 = vadd.f32 %v5323_v6, %v2783_v30 }
 0x3ae   : > { %1933 = vst.msk [vmem:[%s5211_s25 + $0x48] sm:$0xf] %vm1914_vm1, %v3546_v54  ;;  %3511 = vst.msk [vmem:[%s5211_s25 + $0x1d8] sm:$0xf] %vm1914_vm1, %v3646_v34  ;;  %v3547_v63 = vpack.c.bf16 %v1735_v36, %v1735_v36  ;;  %v3647_v24 = vpack.c.bf16 %v2792_v41, %v2792_v41 }
 0x3af   : > { %1931 = vst.msk [vmem:[%s5211_s25 + $0x40] sm:$0xf] %vm1914_vm1, %v3544_v46  ;;  %3509 = vst.msk [vmem:[%s5211_s25 + $0x1d0] sm:$0xf] %vm1914_vm1, %v3644_v57  ;;  %v3545_v49 = vpack.c.bf16 %v1727_v20, %v1727_v20  ;;  %v3645_v53 = vpack.c.bf16 %v2784_v62, %v2784_v62 }
 0x3b0   : > { %1934 = vst.msk [vmem:[%s5211_s25 + $0x4c] sm:$0xf] %vm1914_vm1, %v3547_v63  ;;  %3512 = vst.msk [vmem:[%s5211_s25 + $0x1dc] sm:$0xf] %vm1914_vm1, %v3647_v24 }
 0x3b1   : > { %1932 = vst.msk [vmem:[%s5211_s25 + $0x44] sm:$0xf] %vm1914_vm1, %v3545_v49  ;;  %3510 = vst.msk [vmem:[%s5211_s25 + $0x1d4] sm:$0xf] %vm1914_vm1, %v3645_v53  ;;  %v3881_v48 = vpop.f32.mrb[52].mxu1  ;;  %v3993_v11 = vpop.f32.mrb[84].mxu0 }
 0x3b2   : > { %v1748_v26 = vadd.f32 %v3881_v48, %v5344_v58  ;;  %v2805_v4 = vadd.f32 %v3993_v11, %v5323_v6  ;;  %v1739_v2 = vpop.f32.mrb[53].mxu1  ;;  %v2796_v9 = vpop.f32.mrb[85].mxu0 }
 0x3b3   : > { %v1740_v43 = vadd.f32 %v5344_v58, %v1739_v2  ;;  %v2797_v1 = vadd.f32 %v5323_v6, %v2796_v9  ;;  %v3882_v8 = vpop.f32.mrb[54].mxu1  ;;  %v3994_v10 = vpop.f32.mrb[86].mxu0 }
 0x3b4   : > { %v3550_v61 = vpack.c.bf16 %v1748_v26, %v1748_v26  ;;  %v3650_v60 = vpack.c.bf16 %v2805_v4, %v2805_v4  ;;  %v1751_v52 = vadd.f32 %v3882_v8, %v5344_v58  ;;  %v2808_v5 = vadd.f32 %v3994_v10, %v5323_v6  ;;  %v1742_v14 = vpop.f32.mrb[55].mxu1  ;;  %v2799_v18 = vpop.f32.mrb[87].mxu0  ;;  %v5541_v10 = vld [vmem:[%s5707_s8 + $0x2] ss:$0 sm:$0xff] }
 0x3b5   : > { %v3548_v56 = vpack.c.bf16 %v1740_v43, %v1740_v43  ;;  %v3648_v35 = vpack.c.bf16 %v2797_v1, %v2797_v1  ;;  %v1743_v23 = vadd.f32 %v5344_v58, %v1742_v14  ;;  %v2800_v15 = vadd.f32 %v5323_v6, %v2799_v18 }
 0x3b6   : > { %1937 = vst.msk [vmem:[%s5211_s25 + $0x58] sm:$0xf] %vm1914_vm1, %v3550_v61  ;;  %3515 = vst.msk [vmem:[%s5211_s25 + $0x1e8] sm:$0xf] %vm1914_vm1, %v3650_v60  ;;  %v3551_v22 = vpack.c.bf16 %v1751_v52, %v1751_v52  ;;  %v3651_v17 = vpack.c.bf16 %v2808_v5, %v2808_v5 }
 0x3b7   : > { %1935 = vst.msk [vmem:[%s5211_s25 + $0x50] sm:$0xf] %vm1914_vm1, %v3548_v56  ;;  %3513 = vst.msk [vmem:[%s5211_s25 + $0x1e0] sm:$0xf] %vm1914_vm1, %v3648_v35  ;;  %v3549_v47 = vpack.c.bf16 %v1743_v23, %v1743_v23  ;;  %v3649_v39 = vpack.c.bf16 %v2800_v15, %v2800_v15  ;;  %v1551_v14 = vpop.trf.xlu0 }
 0x3b8   : > { %1938 = vst.msk [vmem:[%s5211_s25 + $0x5c] sm:$0xf] %vm1914_vm1, %v3551_v22  ;;  %3516 = vst.msk [vmem:[%s5211_s25 + $0x1ec] sm:$0xf] %vm1914_vm1, %v3651_v17 }
 0x3b9   : > { %1936 = vst.msk [vmem:[%s5211_s25 + $0x54] sm:$0xf] %vm1914_vm1, %v3549_v47  ;;  %3514 = vst.msk [vmem:[%s5211_s25 + $0x1e4] sm:$0xf] %vm1914_vm1, %v3649_v39  ;;  %v3885_v51 = vpop.f32.mrb[56].mxu1  ;;  %v3997_v16 = vpop.f32.mrb[88].mxu0 }
 0x3ba   : > { %v1764_v32 = vadd.f32 %v3885_v51, %v5344_v58  ;;  %v2821_v42 = vadd.f32 %v3997_v16, %v5323_v6  ;;  %v1755_v3 = vpop.f32.mrb[57].mxu1  ;;  %v2812_v37 = vpop.f32.mrb[89].mxu0 }
 0x3bb   : > { %v1756_v31 = vadd.f32 %v5344_v58, %v1755_v3  ;;  %v2813_v13 = vadd.f32 %v5323_v6, %v2812_v37  ;;  %v3886_v59 = vpop.f32.mrb[58].mxu1  ;;  %v3998_v45 = vpop.f32.mrb[90].mxu0 }
 0x3bc   : > { %v3554_v19 = vpack.c.bf16 %v1764_v32, %v1764_v32  ;;  %v3654_v21 = vpack.c.bf16 %v2821_v42, %v2821_v42  ;;  %v1767_v7 = vadd.f32 %v3886_v59, %v5344_v58  ;;  %v2824_v44 = vadd.f32 %v3998_v45, %v5323_v6  ;;  %v1758_v50 = vpop.f32.mrb[59].mxu1  ;;  %v2815_v25 = vpop.f32.mrb[91].mxu0 }
 0x3bd   : > { %v3552_v0 = vpack.c.bf16 %v1756_v31, %v1756_v31  ;;  %v3652_v27 = vpack.c.bf16 %v2813_v13, %v2813_v13  ;;  %v1759_v28 = vadd.f32 %v5344_v58, %v1758_v50  ;;  %v2816_v55 = vadd.f32 %v5323_v6, %v2815_v25  ;;  %v1552_v32 = vpop.trf.xlu0 }
 0x3be   : > { %1941 = vst.msk [vmem:[%s5211_s25 + $0x68] sm:$0xf] %vm1914_vm1, %v3554_v19  ;;  %3519 = vst.msk [vmem:[%s5211_s25 + $0x1f8] sm:$0xf] %vm1914_vm1, %v3654_v21  ;;  %v3555_v12 = vpack.c.bf16 %v1767_v7, %v1767_v7  ;;  %v3655_v38 = vpack.c.bf16 %v2824_v44, %v2824_v44 }
 0x3bf   : > { %1939 = vst.msk [vmem:[%s5211_s25 + $0x60] sm:$0xf] %vm1914_vm1, %v3552_v0  ;;  %3517 = vst.msk [vmem:[%s5211_s25 + $0x1f0] sm:$0xf] %vm1914_vm1, %v3652_v27  ;;  %v3553_v40 = vpack.c.bf16 %v1759_v28, %v1759_v28  ;;  %v3653_v54 = vpack.c.bf16 %v2816_v55, %v2816_v55 }
 0x3c0   : > { %1942 = vst.msk [vmem:[%s5211_s25 + $0x6c] sm:$0xf] %vm1914_vm1, %v3555_v12  ;;  %3520 = vst.msk [vmem:[%s5211_s25 + $0x1fc] sm:$0xf] %vm1914_vm1, %v3655_v38 }
 0x3c1   : > { %1940 = vst.msk [vmem:[%s5211_s25 + $0x64] sm:$0xf] %vm1914_vm1, %v3553_v40  ;;  %3518 = vst.msk [vmem:[%s5211_s25 + $0x1f4] sm:$0xf] %vm1914_vm1, %v3653_v54  ;;  %v3889_v6 = vpop.f32.mrb[60].mxu1 }
 0x3c2   : > { %v1780_v34 = vadd.f32 %v3889_v6, %v5344_v58  ;;  %v1771_v36 = vpop.f32.mrb[61].mxu1 }
 0x3c3   : > { %v1772_v41 = vadd.f32 %v5344_v58, %v1771_v36  ;;  %v3890_v33 = vpop.f32.mrb[62].mxu1 }
 0x3c4   : > { %v3558_v30 = vpack.c.bf16 %v1780_v34, %v1780_v34  ;;  %v1783_v46 = vadd.f32 %v3890_v33, %v5344_v58  ;;  %v1774_v57 = vpop.f32.mrb[63].mxu1 }
 0x3c5   : > { %v3556_v20 = vpack.c.bf16 %v1772_v41, %v1772_v41  ;;  %v1775_v62 = vadd.f32 %v5344_v58, %v1774_v57 }
 0x3c6   : > { %1945 = vst.msk [vmem:[%s5211_s25 + $0x78] sm:$0xf] %vm1914_vm1, %v3558_v30  ;;  %v3559_v63 = vpack.c.bf16 %v1783_v46, %v1783_v46 }
 0x3c7   : > { %1943 = vst.msk [vmem:[%s5211_s25 + $0x70] sm:$0xf] %vm1914_vm1, %v3556_v20  ;;  %v3557_v24 = vpack.c.bf16 %v1775_v62, %v1775_v62 }
 0x3c8   : > { %1946 = vst.msk [vmem:[%s5211_s25 + $0x7c] sm:$0xf] %vm1914_vm1, %v3559_v63 }
 0x3c9   : > { %1944 = vst.msk [vmem:[%s5211_s25 + $0x74] sm:$0xf] %vm1914_vm1, %v3557_v24  ;;  %v3925_v49 = vpop.f32.mrb[64].mxu1 }
 0x3ca   : > { %v2127_v53 = vadd.f32 %v3925_v49, %v5200_v29  ;;  %v2118_v48 = vpop.f32.mrb[65].mxu1 }
 0x3cb   : > { %v2119_v58 = vadd.f32 %v5200_v29, %v2118_v48  ;;  %v3926_v11 = vpop.f32.mrb[66].mxu1 }
 0x3cc   : > { %v3590_v26 = vpack.c.bf16 %v2127_v53, %v2127_v53  ;;  %v2130_v4 = vadd.f32 %v3926_v11, %v5200_v29  ;;  %v2121_v2 = vpop.f32.mrb[67].mxu1 }
 0x3cd   : > { %v3588_v9 = vpack.c.bf16 %v2119_v58, %v2119_v58  ;;  %v2122_v43 = vadd.f32 %v5200_v29, %v2121_v2 }
 0x3ce   : > { %3343 = vst.msk [vmem:[%s5211_s25 + $0xf8] sm:$0xf] %vm1914_vm1, %v3590_v26  ;;  %v3591_v1 = vpack.c.bf16 %v2130_v4, %v2130_v4 }
 0x3cf   : > { %3341 = vst.msk [vmem:[%s5211_s25 + $0xf0] sm:$0xf] %vm1914_vm1, %v3588_v9  ;;  %v3589_v8 = vpack.c.bf16 %v2122_v43, %v2122_v43 }
 0x3d0   : > { %3344 = vst.msk [vmem:[%s5211_s25 + $0xfc] sm:$0xf] %vm1914_vm1, %v3591_v1 }
 0x3d1   : > { %3342 = vst.msk [vmem:[%s5211_s25 + $0xf4] sm:$0xf] %vm1914_vm1, %v3589_v8  ;;  %v3933_v61 = vpop.f32.mrb[68].mxu1 }
 0x3d2   : > { %v2362_v29 = vadd.f32 %v3933_v61, %v5541_v10  ;;  %v2353_v60 = vpop.f32.mrb[69].mxu1 }
 0x3d3   : > { %v2354_v52 = vadd.f32 %v5541_v10, %v2353_v60  ;;  %v3934_v5 = vpop.f32.mrb[70].mxu1 }
 0x3d4   : > { %v3594_v18 = vpack.c.bf16 %v2362_v29, %v2362_v29  ;;  %v2365_v56 = vadd.f32 %v3934_v5, %v5541_v10  ;;  %v2356_v35 = vpop.f32.mrb[71].mxu1 }
 0x3d5   : > { %v3592_v23 = vpack.c.bf16 %v2354_v52, %v2354_v52  ;;  %v2357_v15 = vadd.f32 %v5541_v10, %v2356_v35 }
 0x3d6   : > { %3403 = vst.msk [vmem:[%s5211_s25 + $0x108] sm:$0xf] %vm1914_vm1, %v3594_v18  ;;  %v3595_v22 = vpack.c.bf16 %v2365_v56, %v2365_v56 }
 0x3d7   : > { %3401 = vst.msk [vmem:[%s5211_s25 + $0x100] sm:$0xf] %vm1914_vm1, %v3592_v23  ;;  %v3593_v17 = vpack.c.bf16 %v2357_v15, %v2357_v15  ;;  %v1567_v47 = vpop.trf.xlu1 }
 0x3d8   : > { %3404 = vst.msk [vmem:[%s5211_s25 + $0x10c] sm:$0xf] %vm1914_vm1, %v3595_v22  ;;  %v3199_v39 = vcombine.low %v1551_v14, %v1567_v47  ;;  %v3200_v51 = vcombine.high %v1551_v14, %v1567_v47 }
 0x3d9   : > { %3402 = vst.msk [vmem:[%s5211_s25 + $0x104] sm:$0xf] %vm1914_vm1, %v3593_v17  ;;  %v3937_v16 = vpop.f32.mrb[72].mxu1 }
 0x3da   : > { %v2378_v42 = vadd.f32 %v3937_v16, %v5541_v10  ;;  %v2369_v3 = vpop.f32.mrb[73].mxu1  ;;  %1581 = vst [vmem:[%s398_s19] sm:$0xff] %v3199_v39  ;;  %3201 = vst [vmem:[%s398_s19 + $0x8] sm:$0xff] %v3200_v51 }
 0x3db   : > { %v2370_v37 = vadd.f32 %v5541_v10, %v2369_v3  ;;  %v3938_v31 = vpop.f32.mrb[74].mxu1  ;;  %v1568_v13 = vpop.trf.xlu1 }
 0x3dc   : > { %v3598_v59 = vpack.c.bf16 %v2378_v42, %v2378_v42  ;;  %v2381_v45 = vadd.f32 %v3938_v31, %v5541_v10  ;;  %v2372_v19 = vpop.f32.mrb[75].mxu1  ;;  %v3202_v21 = vcombine.low %v1552_v32, %v1568_v13  ;;  %v3204_v7 = vcombine.high %v1552_v32, %v1568_v13 }
 0x3dd   : > { %v3596_v44 = vpack.c.bf16 %v2370_v37, %v2370_v37  ;;  %v2373_v50 = vadd.f32 %v5541_v10, %v2372_v19 }
 0x3de   : > { %3407 = vst.msk [vmem:[%s5211_s25 + $0x118] sm:$0xf] %vm1914_vm1, %v3598_v59  ;;  %v3599_v25 = vpack.c.bf16 %v2381_v45, %v2381_v45  ;;  %3203 = vst [vmem:[%s398_s19 + $0x10] sm:$0xff] %v3202_v21 }
 0x3df   : > { %3205 = vst [vmem:[%s398_s19 + $0x18] sm:$0xff] %v3204_v7  ;;  %3405 = vst.msk [vmem:[%s5211_s25 + $0x110] sm:$0xf] %vm1914_vm1, %v3596_v44  ;;  %v3597_v0 = vpack.c.bf16 %v2373_v50, %v2373_v50 }
 0x3e0   : > { %4210 = shalt.err (!%p4207_p4)
}
 0x3e1   : > { %s4211_s19 = scalar_lea.hbm %s5568_s29, 512  ;;  %s4215_s16 = scalar_lea.hbm %s5708_s9, 1024 }
 0x3e2   : > { %p4212_p7 = scmp.ne.s32.totalorder %s5568_s29, %s4211_s19  ;;  %p4216_p1 = scmp.lt.u32.totalorder %s5568_s29, %s5708_s9 }
 0x3e3   : > { %p4217_p3 = scmp.lt.u32.totalorder %s4215_s16, %s4211_s19  ;;  %p4219_p9 = scmp.lt.u32.totalorder %s4211_s19, %s5568_s29 }
 0x3e4   : > { %p4213_p10 = pnand %p4212_p7, %p5721_p11 }
 0x3e5   : > { %p4218_p8 = por %p4217_p3, %p4216_p1 }
 0x3e6   : > { %p4214_p12 = pneg %p4213_p10 }
 0x3e7   : > { %p4220_p0 = por %p4219_p9, %p4218_p8 }
 0x3e9   : > { %p4221_p6 = pnand %p4220_p0, %p4214_p12 }
 0x3eb   : > { %4224 = shalt.err (!%p4221_p6)
}
 0x3ec   : > { %s4285_s17 = smov 128   ;;  %s4286_s22 = smov 8   ;;  %3408 = vst.msk [vmem:[%s5211_s25 + $0x11c] sm:$0xf] %vm1914_vm1, %v3599_v25  ;;  %3406 = vst.msk [vmem:[%s5211_s25 + $0x114] sm:$0xf] %vm1914_vm1, %v3597_v0 }
 0x3ed   : > { %4005 = dma.vmem_to_hbm [thread:$0]  (%p5721_p11), %s5562_s11, 512, %s5568_s29, %s2989_s30, %s4285_s17, %s4285_s17, %s4286_s22   ;;  %v3941_v27 = vpop.f32.mrb[76].mxu1 }
 0x3ee   : > { %v2394_v28 = vadd.f32 %v3941_v27, %v5541_v10  ;;  %v2385_v55 = vpop.f32.mrb[77].mxu1 }
 0x3ef   : > { %v2386_v12 = vadd.f32 %v5541_v10, %v2385_v55  ;;  %v3942_v38 = vpop.f32.mrb[78].mxu1 }
 0x3f0   : > { %v3602_v40 = vpack.c.bf16 %v2394_v28, %v2394_v28  ;;  %v2397_v54 = vadd.f32 %v3942_v38, %v5541_v10  ;;  %v2388_v6 = vpop.f32.mrb[79].mxu1 }
 0x3f1   : > { %v3600_v34 = vpack.c.bf16 %v2386_v12, %v2386_v12  ;;  %v2389_v36 = vadd.f32 %v5541_v10, %v2388_v6  ;;  %v3945_v30 = vpop.f32.mrb[80].mxu1 }
 0x3f2   : > { %3411 = vst.msk [vmem:[%s5211_s25 + $0x128] sm:$0xf] %vm1914_vm1, %v3602_v40  ;;  %v3603_v41 = vpack.c.bf16 %v2397_v54, %v2397_v54  ;;  %v2410_v46 = vadd.f32 %v3945_v30, %v5541_v10  ;;  %v2401_v57 = vpop.f32.mrb[81].mxu1 }
 0x3f3   : > { %3409 = vst.msk [vmem:[%s5211_s25 + $0x120] sm:$0xf] %vm1914_vm1, %v3600_v34  ;;  %v3601_v33 = vpack.c.bf16 %v2389_v36, %v2389_v36  ;;  %v2402_v20 = vadd.f32 %v5541_v10, %v2401_v57  ;;  %v3946_v62 = vpop.f32.mrb[82].mxu1 }
 0x3f4   : > { %3412 = vst.msk [vmem:[%s5211_s25 + $0x12c] sm:$0xf] %vm1914_vm1, %v3603_v41  ;;  %v3606_v63 = vpack.c.bf16 %v2410_v46, %v2410_v46  ;;  %v2413_v24 = vadd.f32 %v3946_v62, %v5541_v10  ;;  %v2404_v49 = vpop.f32.mrb[83].mxu1 }
 0x3f5   : > { %3410 = vst.msk [vmem:[%s5211_s25 + $0x124] sm:$0xf] %vm1914_vm1, %v3601_v33  ;;  %v3604_v53 = vpack.c.bf16 %v2402_v20, %v2402_v20  ;;  %v2405_v48 = vadd.f32 %v5541_v10, %v2404_v49  ;;  %v3949_v26 = vpop.f32.mrb[84].mxu1 }
 0x3f6   : > { %3415 = vst.msk [vmem:[%s5211_s25 + $0x138] sm:$0xf] %vm1914_vm1, %v3606_v63  ;;  %v3607_v58 = vpack.c.bf16 %v2413_v24, %v2413_v24  ;;  %v2426_v4 = vadd.f32 %v3949_v26, %v5541_v10  ;;  %v2417_v2 = vpop.f32.mrb[85].mxu1 }
 0x3f7   : > { %3413 = vst.msk [vmem:[%s5211_s25 + $0x130] sm:$0xf] %vm1914_vm1, %v3604_v53  ;;  %v3605_v11 = vpack.c.bf16 %v2405_v48, %v2405_v48  ;;  %v2418_v9 = vadd.f32 %v5541_v10, %v2417_v2  ;;  %v3950_v43 = vpop.f32.mrb[86].mxu1 }
 0x3f8   : > { %3416 = vst.msk [vmem:[%s5211_s25 + $0x13c] sm:$0xf] %vm1914_vm1, %v3607_v58  ;;  %v3610_v1 = vpack.c.bf16 %v2426_v4, %v2426_v4  ;;  %v2429_v8 = vadd.f32 %v3950_v43, %v5541_v10  ;;  %v2420_v61 = vpop.f32.mrb[87].mxu1 }
 0x3f9   : > { %3414 = vst.msk [vmem:[%s5211_s25 + $0x134] sm:$0xf] %vm1914_vm1, %v3605_v11  ;;  %v3608_v29 = vpack.c.bf16 %v2418_v9, %v2418_v9  ;;  %v2421_v60 = vadd.f32 %v5541_v10, %v2420_v61  ;;  %v3953_v14 = vpop.f32.mrb[88].mxu1 }
 0x3fa   : > { %3419 = vst.msk [vmem:[%s5211_s25 + $0x148] sm:$0xf] %vm1914_vm1, %v3610_v1  ;;  %v3611_v52 = vpack.c.bf16 %v2429_v8, %v2429_v8  ;;  %v2442_v18 = vadd.f32 %v3953_v14, %v5541_v10  ;;  %v2433_v56 = vpop.f32.mrb[89].mxu1 }
 0x3fb   : > { %3417 = vst.msk [vmem:[%s5211_s25 + $0x140] sm:$0xf] %vm1914_vm1, %v3608_v29  ;;  %v3609_v5 = vpack.c.bf16 %v2421_v60, %v2421_v60  ;;  %v2434_v35 = vadd.f32 %v5541_v10, %v2433_v56  ;;  %v3954_v23 = vpop.f32.mrb[90].mxu1 }
 0x3fc   : > { %3420 = vst.msk [vmem:[%s5211_s25 + $0x14c] sm:$0xf] %vm1914_vm1, %v3611_v52  ;;  %v3614_v15 = vpack.c.bf16 %v2442_v18, %v2442_v18  ;;  %v2445_v22 = vadd.f32 %v3954_v23, %v5541_v10  ;;  %v2436_v17 = vpop.f32.mrb[91].mxu1 }
 0x3fd   : > { %3418 = vst.msk [vmem:[%s5211_s25 + $0x144] sm:$0xf] %vm1914_vm1, %v3609_v5  ;;  %v3612_v47 = vpack.c.bf16 %v2434_v35, %v2434_v35  ;;  %v2437_v39 = vadd.f32 %v5541_v10, %v2436_v17 }
 0x3fe   : > { %3423 = vst.msk [vmem:[%s5211_s25 + $0x158] sm:$0xf] %vm1914_vm1, %v3614_v15  ;;  %v3615_v51 = vpack.c.bf16 %v2445_v22, %v2445_v22 }
 0x3ff   : > { %3421 = vst.msk [vmem:[%s5211_s25 + $0x150] sm:$0xf] %vm1914_vm1, %v3612_v47  ;;  %v3613_v16 = vpack.c.bf16 %v2437_v39, %v2437_v39 }
 0x400   : > { %3424 = vst.msk [vmem:[%s5211_s25 + $0x15c] sm:$0xf] %vm1914_vm1, %v3615_v51 }
 0x401   : > { %3422 = vst.msk [vmem:[%s5211_s25 + $0x154] sm:$0xf] %vm1914_vm1, %v3613_v16  ;;  %v3957_v32 = vpop.f32.mrb[92].mxu1 }
 0x402   : > { %v2458_v42 = vadd.f32 %v3957_v32, %v5541_v10  ;;  %v2449_v3 = vpop.f32.mrb[93].mxu1 }
 0x403   : > { %v2450_v37 = vadd.f32 %v5541_v10, %v2449_v3  ;;  %v3958_v31 = vpop.f32.mrb[94].mxu1 }
 0x404   : > { %v3618_v13 = vpack.c.bf16 %v2458_v42, %v2458_v42  ;;  %v2461_v59 = vadd.f32 %v3958_v31, %v5541_v10  ;;  %v2452_v45 = vpop.f32.mrb[95].mxu1 }
 0x405   : > { %v3616_v19 = vpack.c.bf16 %v2450_v37, %v2450_v37  ;;  %v2453_v21 = vadd.f32 %v5541_v10, %v2452_v45 }
 0x406   : > { %3427 = vst.msk [vmem:[%s5211_s25 + $0x168] sm:$0xf] %vm1914_vm1, %v3618_v13  ;;  %v3619_v7 = vpack.c.bf16 %v2461_v59, %v2461_v59 }
 0x407   : > { %3425 = vst.msk [vmem:[%s5211_s25 + $0x160] sm:$0xf] %vm1914_vm1, %v3616_v19  ;;  %v3617_v44 = vpack.c.bf16 %v2453_v21, %v2453_v21 }
 0x408   : > { %3428 = vst.msk [vmem:[%s5211_s25 + $0x16c] sm:$0xf] %vm1914_vm1, %v3619_v7 }
 0x409   : > { %3426 = vst.msk [vmem:[%s5211_s25 + $0x164] sm:$0xf] %vm1914_vm1, %v3617_v44  ;;  %v3961_v50 = vpop.f32.mrb[96].mxu1 }
 0x40a   : > { %v2474_v25 = vadd.f32 %v3961_v50, %v5541_v10  ;;  %v2465_v0 = vpop.f32.mrb[97].mxu1 }
 0x40b   : > { %v2466_v27 = vadd.f32 %v5541_v10, %v2465_v0  ;;  %v3962_v28 = vpop.f32.mrb[98].mxu1 }
 0x40c   : > { %v3622_v55 = vpack.c.bf16 %v2474_v25, %v2474_v25  ;;  %v2477_v12 = vadd.f32 %v3962_v28, %v5541_v10  ;;  %v2468_v38 = vpop.f32.mrb[99].mxu1 }
 0x40d   : > { %v3620_v40 = vpack.c.bf16 %v2466_v27, %v2466_v27  ;;  %v2469_v54 = vadd.f32 %v5541_v10, %v2468_v38 }
 0x40e   : > { %3431 = vst.msk [vmem:[%s5211_s25 + $0x178] sm:$0xf] %vm1914_vm1, %v3622_v55  ;;  %v3623_v6 = vpack.c.bf16 %v2477_v12, %v2477_v12 }
 0x40f   : > { %3429 = vst.msk [vmem:[%s5211_s25 + $0x170] sm:$0xf] %vm1914_vm1, %v3620_v40  ;;  %v3621_v34 = vpack.c.bf16 %v2469_v54, %v2469_v54 }
 0x410   : > { %3432 = vst.msk [vmem:[%s5211_s25 + $0x17c] sm:$0xf] %vm1914_vm1, %v3623_v6 }
 0x411   : > { %3430 = vst.msk [vmem:[%s5211_s25 + $0x174] sm:$0xf] %vm1914_vm1, %v3621_v34 }
 0x412 PF: > { %s3032_s26 = sand.u32 1, %s4259_s13   ;;  %p5722_p11 = scmp.ne.s32.totalorder %s5718_s28, 0 }
 0x413   : > { %p5723_p13 = scmp.ge.s32.totalorder %s4279_s18, 2  ;;  %s3033_s20 = scalar_lea.sflag [#allocation4], %s3032_s26 }
 0x415   : > { %p4012_p2 = pnand %p5723_p13, %p5722_p11 }
 0x417   : > { %4254 = dma.done.wait (!%p4012_p2), %s3033_s20, 512  }
 0x418   : > { %4256 = vsyncadd (!%p4012_p2), %s3033_s20, 4294966784  ;;  %s27_s18 = sadd.s32 1, %s4279_s18   ;;  %s5724_s16 = sld [smem:[#allocation8_spill]] }
 0x419   : > { %p24_p5 = scmp.ge.s32.totalorder %s27_s18, 4   ;;  %s5725_s17 = sld [smem:[#allocation9_spill]] }
 0x41a   : > { %s5726_s13 = smov %s4263_s14  ;;  %s5727_s14 = smov %s4267_s15 }
 0x41b   : > { %s5728_s15 = smov %s4398_s27  ;;  %26 = sbr.rel (!%p24_p5) target bundleno = 6 (0x6), region = 125 }
 0x422   :  { %3050 = vsyncpa [#allocation3], 1 }
 0x423   :  { %3052 = vsyncpa [#allocation3 + $0x1], 1 }
 0x424   :  { %3053 = vsyncpa [#allocation4], 1 }
 0x425   :  { %3055 = vsyncpa [#allocation4 + $0x1], 1 }

</bundles_post_ra>
